<compile_context>
chip_gen: v7x
topology: tpu7x:2x2x1
jax: 0.10.0
libtpu: 0.0.40
codegen_flags: <defaults>
</compile_context>

<pallas_src>
import functools

import jax
import jax.numpy as jnp
import numpy as np
from jax import lax
from jax.experimental import pallas as pl
from jax.experimental.pallas import tpu as pltpu


def _bilinear_matrix(in_size: int, out_size: int) -> np.ndarray:
    """PyTorch nn.Upsample(mode='bilinear', align_corners=False) weights."""
    w = np.zeros((out_size, in_size), dtype=np.float64)
    scale = in_size / out_size
    for o in range(out_size):
        src = scale * (o + 0.5) - 0.5
        if src < 0.0:
            src = 0.0
        i0 = min(int(np.floor(src)), in_size - 1)
        i1 = min(i0 + 1, in_size - 1)
        l1 = src - float(i0)
        w[o, i0] += 1.0 - l1
        w[o, i1] += l1
    return w.astype(np.float32)


def _round_up(x: int, m: int) -> int:
    return ((x + m - 1) // m) * m


def _vmem_capacity_bytes() -> int:
    """Physical VMEM per TensorCore; conservative (v7x-sized) fallback."""
    try:
        cap = getattr(pltpu.get_tpu_info(), "vmem_capacity_bytes", None)
        if cap:
            return int(cap)
    except Exception:
        pass
    return 64 * 1024 * 1024


def _num_tensorcores() -> int:
    """TensorCores reachable from one pallas_call (v7x: 2, v5e/v6e: 1)."""
    try:
        info = pltpu.get_tpu_info()
        for name in ("num_cores", "core_count", "num_tensorcores"):
            v = getattr(info, name, None)
            if v:
                return int(v)
    except Exception:
        pass
    try:
        if "7" in jax.devices()[0].device_kind:
            return 2
    except Exception:
        pass
    return 1


# ---------------------------------------------------------------------------
# Kernels
# ---------------------------------------------------------------------------
def _fused_kernel(xr_ref, xi_ref, w_ref, or_ref, oi_ref):
    # xr/xi: (TB, K)   w: (K, M_pad)   outputs: (TB, M_pad) lane-dense slabs.
    w = w_ref[...]
    or_ref[...] = jnp.dot(xr_ref[...], w,
                          preferred_element_type=jnp.float32).astype(or_ref.dtype)
    oi_ref[...] = jnp.dot(xi_ref[...], w,
                          preferred_element_type=jnp.float32).astype(oi_ref.dtype)


def _separable_kernel(xr_ref, xi_ref, whT_ref, wwT_ref, or_ref, oi_ref):
    # Fallback for large spatial sizes (kron weight would not fit in VMEM).
    # xr/xi: (TB, H_in, W_in)   whT: (H_in, H_out)   wwT: (W_in, W_out)
    # Two large flattened GEMMs; the H/W axis swaps run on the XLU and overlap
    # the MXU (instead of TB tiny (H_out,H_in)@(H_in,W_out) micro-matmuls).
    whT = whT_ref[...]
    wwT = wwT_ref[...]
    h_out = whT.shape[1]
    w_out = wwT.shape[1]

    def up(x):
        tb, h_in, w_in = x.shape
        t = jnp.dot(x.reshape(tb * h_in, w_in), wwT,
                    preferred_element_type=jnp.float32)              # (TB*H_in, W_out)
        t = pltpu.einshape("bhw->bwh", t.reshape(tb, h_in, w_out))    # (TB, W_out, H_in)
        u = jnp.dot(t.reshape(tb * w_out, h_in), whT,
                    preferred_element_type=jnp.float32)              # (TB*W_out, H_out)
        return pltpu.einshape("bwh->bhw", u.reshape(tb, w_out, h_out))

    or_ref[...] = up(xr_ref[...]).astype(or_ref.dtype)
    oi_ref[...] = up(xi_ref[...]).astype(oi_ref.dtype)


# ---------------------------------------------------------------------------
# Wrapper
# ---------------------------------------------------------------------------
@functools.partial(jax.jit, static_argnames=("size", "use_bf16"))
def complex_upsample2d(x: jax.Array, size, use_bf16: bool = False) -> jax.Array:
    """x: complex64 [N, C, H_in, W_in] -> complex64 [N, C, H_out, W_out]."""
    if isinstance(size, int):
        size = (size, size)
    n, c, h_in, w_in = x.shape
    h_out, w_out = size
    b = n * c
    k = h_in * w_in
    m = h_out * w_out
    m_pad = _round_up(m, 128)                    # lane-dense unmasked stores

    compute_dtype = jnp.bfloat16 if use_bf16 else jnp.float32
    in_itemsize = jnp.dtype(compute_dtype).itemsize

    wh = _bilinear_matrix(h_in, h_out)           # (H_out, H_in)
    ww = _bilinear_matrix(w_in, w_out)           # (W_out, W_in)

    # No HBM concat: real/imag go in as two separate operands.
    # TODO(synk): zero-copy complex64<->f32 view blocked by lax.bitcast_convert_type
    # not supporting complex dtypes; the extraction/recombination stay in XLA.
    xr = jnp.real(x).astype(compute_dtype)
    xi = jnp.imag(x).astype(compute_dtype)

    # ---- generation-aware VMEM / block sizing ------------------------------
    vmem_cap = _vmem_capacity_bytes()
    vmem_limit = min((vmem_cap * 3) // 4, vmem_cap - 8 * 1024 * 1024)

    fuse_threshold = (24 * 1024 * 1024 if vmem_cap >= 96 * 1024 * 1024
                      else 4 * 1024 * 1024)
    w_fused_bytes = k * m_pad * in_itemsize

    def _plane_budget(fused: bool):
        if fused:
            w_res = 2 * w_fused_bytes                          # double-buffered weight
            per_plane = 2 * 2 * (in_itemsize * k + 4 * m_pad)  # {re,im} x dbl-buffer
        else:
            w_res = 2 * (h_in * h_out + w_in * w_out) * in_itemsize
            per_plane = (2 * 2 * (in_itemsize * k + 4 * m)
                         + 2 * 4 * h_in * w_out)               # + separable intermediate
        return w_res, per_plane

    fuse = w_fused_bytes <= fuse_threshold
    w_res, per_plane = _plane_budget(fuse)
    io_budget = vmem_limit - w_res - 6 * 1024 * 1024           # Mosaic scratch headroom
    if fuse and io_budget < 8 * per_plane:
        fuse = False
        w_res, per_plane = _plane_budget(False)
        io_budget = vmem_limit - w_res - 6 * 1024 * 1024

    tb_cap = max(8, (max(io_budget, 0) // per_plane) // 8 * 8)
    # Only split work for multi-TensorCore chips (v7x); on v5e/v6e the grid is a
    # serial loop, so a single maximal block per step is strictly better.
    if _num_tensorcores() >= 2 and b > 8:
        tb_cap = min(tb_cap, max(8, _round_up(pl.cdiv(b, 2), 8)))

    tb = b if b <= tb_cap else tb_cap
    grid = (pl.cdiv(b, tb),)                    # last block partial -> masked writeback

    compiler_params = pltpu.CompilerParams(
        dimension_semantics=("parallel",),
        vmem_limit_bytes=int(vmem_limit),
    )

    if fuse:
        # Fused weight: W[(ih*W_in+iw), (oh*W_out+ow)] = Wh[oh,ih] * Ww[ow,iw]
        w_np = np.kron(wh, ww).T                               # (K, M)
        if m_pad != m:
            w_np = np.pad(w_np, ((0, 0), (0, m_pad - m)))      # zero output columns
        w_fused = jnp.asarray(w_np, dtype=compute_dtype)

        xr2 = xr.reshape(b, k)
        xi2 = xi.reshape(b, k)

        out_r, out_i = pl.pallas_call(
            _fused_kernel,
            out_shape=(jax.ShapeDtypeStruct((b, m_pad), jnp.float32),
                       jax.ShapeDtypeStruct((b, m_pad), jnp.float32)),
            grid_spec=pltpu.PrefetchScalarGridSpec(
                num_scalar_prefetch=0,
                grid=grid,
                in_specs=[
                    pl.BlockSpec((tb, k), lambda i: (i, 0)),
                    pl.BlockSpec((tb, k), lambda i: (i, 0)),
                    pl.BlockSpec((k, m_pad), lambda i: (0, 0)),
                ],
                out_specs=[
                    pl.BlockSpec((tb, m_pad), lambda i: (i, 0)),
                    pl.BlockSpec((tb, m_pad), lambda i: (i, 0)),
                ],
            ),
            compiler_params=compiler_params,
            cost_estimate=pl.CostEstimate(
                flops=2 * 2 * b * k * m_pad,
                transcendentals=0,
                bytes_accessed=(2 * b * k * in_itemsize + 2 * b * m_pad * 4
                                + k * m_pad * in_itemsize)),
        )(xr2, xi2, w_fused)

        out_r = out_r[:, :m].reshape(n, c, h_out, w_out)
        out_i = out_i[:, :m].reshape(n, c, h_out, w_out)
    else:
        whT = jnp.asarray(wh.T, dtype=compute_dtype)           # (H_in, H_out)
        wwT = jnp.asarray(ww.T, dtype=compute_dtype)           # (W_in, W_out)

        xr3 = xr.reshape(b, h_in, w_in)
        xi3 = xi.reshape(b, h_in, w_in)

        out_r, out_i = pl.pallas_call(
            _separable_kernel,
            out_shape=(jax.ShapeDtypeStruct((b, h_out, w_out), jnp.float32),
                       jax.ShapeDtypeStruct((b, h_out, w_out), jnp.float32)),
            grid_spec=pltpu.PrefetchScalarGridSpec(
                num_scalar_prefetch=0,
                grid=grid,
                in_specs=[
                    pl.BlockSpec((tb, h_in, w_in), lambda i: (i, 0, 0)),
                    pl.BlockSpec((tb, h_in, w_in), lambda i: (i, 0, 0)),
                    pl.BlockSpec((h_in, h_out), lambda i: (0, 0)),
                    pl.BlockSpec((w_in, w_out), lambda i: (0, 0)),
                ],
                out_specs=[
                    pl.BlockSpec((tb, h_out, w_out), lambda i: (i, 0, 0)),
                    pl.BlockSpec((tb, h_out, w_out), lambda i: (i, 0, 0)),
                ],
            ),
            compiler_params=compiler_params,
            cost_estimate=pl.CostEstimate(
                flops=2 * 2 * b * (h_in * w_in * w_out + w_out * h_in * h_out),
                transcendentals=0,
                bytes_accessed=(2 * b * k * in_itemsize + 2 * b * m * 4)),
        )(xr3, xi3, whT, wwT)

        out_r = out_r.reshape(n, c, h_out, w_out)
        out_i = out_i.reshape(n, c, h_out, w_out)

    return lax.complex(out_r, out_i)


if __name__ == "__main__":
    key = jax.random.PRNGKey(0)
    kr, ki = jax.random.split(key)
    n, c, h, w = 2, 4, 16, 16
    size = (32, 32)                              # ComplexUpsample2d(size=(32, 32))

    x = (jax.random.normal(kr, (n, c, h, w), dtype=jnp.float32)
         + 1j * jax.random.normal(ki, (n, c, h, w), dtype=jnp.float32))

    out = complex_upsample2d(x, size)
    jax.block_until_ready(out)
    assert out.shape == (n, c, size[0], size[1])
    assert jnp.iscomplexobj(out)

    # Reference: same separable interpolation matrices, plain XLA at HIGHEST
    # precision (true f32 passes), so the check is robust to TPU matmul modes.
    wh_ref = jnp.asarray(_bilinear_matrix(h, size[0]))
    ww_ref = jnp.asarray(_bilinear_matrix(w, size[1]))
    ref_r = jnp.einsum("oh,pw,nchw->ncop", wh_ref, ww_ref, jnp.real(x),
                       precision=lax.Precision.HIGHEST)
    ref_i = jnp.einsum("oh,pw,nchw->ncop", wh_ref, ww_ref, jnp.imag(x),
                       precision=lax.Precision.HIGHEST)
    ref = ref_r + 1j * ref_i
    assert jnp.allclose(out, ref, rtol=2e-2, atol=2e-2)

    # Opt-in bf16 fast path (2x upsample weights are exact in bf16).
    out_bf16 = complex_upsample2d(x, size, use_bf16=True)
    jax.block_until_ready(out_bf16)
    assert out_bf16.shape == (n, c, size[0], size[1])
    assert jnp.allclose(out_bf16, ref, rtol=6e-2, atol=6e-2)

    print("KERNEL_OK")
</pallas_src>

<mosaic_0001>
module attributes {stable_mosaic.version = 11 : i64} {
  func.func @_fused_kernel(%arg0: i32, %arg1: memref<8x256xf32, #tpu.memory_space<vmem>>, %arg2: memref<8x256xf32, #tpu.memory_space<vmem>>, %arg3: memref<256x1024xf32, #tpu.memory_space<vmem>>, %arg4: memref<8x1024xf32, #tpu.memory_space<vmem>>, %arg5: memref<8x1024xf32, #tpu.memory_space<vmem>>) attributes {dimension_semantics = [#tpu.dimension_semantics<parallel>], iteration_bounds = array<i64: 1>, scalar_prefetch = 0 : i64, scratch_operands = 0 : i64, tpu.core_type = #tpu.core_type<tc>, window_params = [{transform_indices = @transform_0, window_bounds = array<i64: 8, 256>}, {transform_indices = @transform_1, window_bounds = array<i64: 8, 256>}, {pipeline_mode = #tpu.pipeline_mode<synchronous>, transform_indices = @transform_2, window_bounds = array<i64: 256, 1024>}, {transform_indices = @transform_3, window_bounds = array<i64: 8, 1024>}, {transform_indices = @transform_4, window_bounds = array<i64: 8, 1024>}]} {
    %c0 = arith.constant 0 : index
    %c0_0 = arith.constant 0 : index
    %0 = vector.load %arg3[%c0, %c0_0] : memref<256x1024xf32, #tpu.memory_space<vmem>>, vector<256x1024xf32>
    %c0_1 = arith.constant 0 : index
    %c0_2 = arith.constant 0 : index
    %1 = vector.load %arg1[%c0_1, %c0_2] : memref<8x256xf32, #tpu.memory_space<vmem>>, vector<8x256xf32>
    %cst = arith.constant dense<0.000000e+00> : vector<8x1024xf32>
    %2 = tpu.matmul %1, %0, %cst {dimension_numbers = #tpu.dot_dimension_numbers<[1], [0], [0], [1], [0, 0, 1, 1], [], []>} : vector<8x256xf32>, vector<256x1024xf32>, vector<8x1024xf32> -> vector<8x1024xf32>
    %c0_3 = arith.constant 0 : index
    %c0_4 = arith.constant 0 : index
    %3 = vector.load %arg4[%c0_3, %c0_4] : memref<8x1024xf32, #tpu.memory_space<vmem>>, vector<8x1024xf32>
    tpu.vector_store %arg4[%c0_3, %c0_4], %2 {strides = array<i32>} : memref<8x1024xf32, #tpu.memory_space<vmem>>, vector<8x1024xf32>,
    %c0_5 = arith.constant 0 : index
    %c0_6 = arith.constant 0 : index
    %4 = vector.load %arg2[%c0_5, %c0_6] : memref<8x256xf32, #tpu.memory_space<vmem>>, vector<8x256xf32>
    %cst_7 = arith.constant dense<0.000000e+00> : vector<8x1024xf32>
    %5 = tpu.matmul %4, %0, %cst_7 {dimension_numbers = #tpu.dot_dimension_numbers<[1], [0], [0], [1], [0, 0, 1, 1], [], []>} : vector<8x256xf32>, vector<256x1024xf32>, vector<8x1024xf32> -> vector<8x1024xf32>
    %c0_8 = arith.constant 0 : index
    %c0_9 = arith.constant 0 : index
    %6 = vector.load %arg5[%c0_8, %c0_9] : memref<8x1024xf32, #tpu.memory_space<vmem>>, vector<8x1024xf32>
    tpu.vector_store %arg5[%c0_8, %c0_9], %5 {strides = array<i32>} : memref<8x1024xf32, #tpu.memory_space<vmem>>, vector<8x1024xf32>,
    return
  }
  func.func @transform_0(%arg0: i32) -> (i32, i32) {
    %c0_i32 = arith.constant 0 : i32
    %c0_i32_0 = arith.constant 0 : i32
    return %arg0, %c0_i32 : i32, i32
  }
  func.func @transform_1(%arg0: i32) -> (i32, i32) {
    %c0_i32 = arith.constant 0 : i32
    %c0_i32_0 = arith.constant 0 : i32
    return %arg0, %c0_i32 : i32, i32
  }
  func.func @transform_2(%arg0: i32) -> (i32, i32) {
    %c0_i32 = arith.constant 0 : i32
    %c0_i32_0 = arith.constant 0 : i32
    %c0_i32_1 = arith.constant 0 : i32
    return %c0_i32, %c0_i32_0 : i32, i32
  }
  func.func @transform_3(%arg0: i32) -> (i32, i32) {
    %c0_i32 = arith.constant 0 : i32
    %c0_i32_0 = arith.constant 0 : i32
    return %arg0, %c0_i32 : i32, i32
  }
  func.func @transform_4(%arg0: i32) -> (i32, i32) {
    %c0_i32 = arith.constant 0 : i32
    %c0_i32_0 = arith.constant 0 : i32
    return %arg0, %c0_i32 : i32, i32
  }
}

</mosaic_0001>

<bundles_post_ra>
// kernel: custom-call
= control target key start
LH: loop header
LB: loop body
LE: loop exit
PB: predicated region body
PF: predicated region fallthrough
CT: control target
= control target key end

     0   :  { %2 = vsyncpa [#allocation0], 0  ;;  %s61_s0 = inlined_call_operand.hbm [shape: c64[2,4,16,16], index: 0, kind: input, shape index: {}]   ;;  %s62_s1 = inlined_call_operand.vmem [shape: f32[2,4,16,16], index: 1, kind: output, shape index: {}]  }
   0x1   :  { %s3_s8 = sshll.u32 %s62_s1, 4  ;;  %s9_s11 = scalar_lea.hbm %s61_s0, 2048  ;;  %s4_s8 = int_to_ptr.vmem [resolvable:$true] %s3_s8 }
   0x2   :  { %p10_p0 = scmp.ne.s32.totalorder %s61_s0, %s9_s11  ;;  %s11_s16 = scalar_lea.hbm %s61_s0, 4096 }
   0x3   :  { %p12_p1 = scmp.lt.u32.totalorder %s11_s16, %s9_s11  ;;  %p13_p2 = scmp.lt.u32.totalorder %s9_s11, %s61_s0 }
   0x5   :  { %p14_p3 = por %p13_p2, %p12_p1 }
   0x7   :  { %p15_p4 = pnand %p14_p3, %p10_p0 }
   0x9   :  { %18 = shalt.err (!%p15_p4)  }
   0xa   :  { %s19_s1 = scalar_lea.vmem %s4_s8, 2048  ;;  %p24_p6 = scmp.lt.s32.totalorder %s4_s8, %s4_s8 }
   0xb   :  { %p20_p5 = scmp.ne.s32.totalorder %s4_s8, %s19_s1  ;;  %p25_p7 = scmp.lt.s32.totalorder %s19_s1, %s19_s1 }
   0xd   :  { %p26_p8 = por %p25_p7, %p24_p6 }
   0xf   :  { %p27_p9 = pnand %p26_p8, %p20_p5 }
  0x11   :  { %30 = shalt.err (!%p27_p9)  }
  0x12   :  { %6 = dma.hbm_to_vmem [thread:$0]  %s61_s0, 2048, %s4_s8, [#allocation0] }
  0x13   :  { %31 = dma.done.wait [#allocation0], 2048  }
  0x14   :  { %32 = vsyncadd [#allocation0], 4294965248 }
  0x15   :  { %8 = vsyncpa [#allocation0], 1 }

// kernel: custom-call.1
= control target key start
LH: loop header
LB: loop body
LE: loop exit
PB: predicated region body
PF: predicated region fallthrough
CT: control target
= control target key end

     0   :  { %s59_s0 = inlined_call_operand.hbm [shape: c64[2,4,16,16], index: 0, kind: input, shape index: {}]   ;;  %s60_s1 = inlined_call_operand.vmem [shape: f32[2,4,16,16], index: 1, kind: output, shape index: {}]  }
   0x1   :  { %s2_s8 = scalar_lea.hbm %s59_s0, 2048 }
   0x2   :  { %3 = vsyncpa [#allocation0], 0  ;;  %s4_s11 = sshll.u32 %s60_s1, 4  ;;  %s34_s14 = scalar_lea.hbm %s59_s0, 4096  ;;  %s5_s11 = int_to_ptr.vmem [resolvable:$true] %s4_s11 }
   0x3   :  { %p11_p0 = scmp.ne.s32.totalorder %s2_s8, %s34_s14  ;;  %p13_p1 = scmp.lt.u32.totalorder %s2_s8, %s59_s0 }
   0x4   :  { %p14_p2 = scmp.lt.u32.totalorder %s34_s14, %s34_s14  ;;  %p16_p4 = scmp.lt.u32.totalorder %s34_s14, %s2_s8 }
   0x6   :  { %p15_p3 = por %p14_p2, %p13_p1 }
   0x8   :  { %p17_p5 = por %p16_p4, %p15_p3 }
   0xa   :  { %p18_p6 = pnand %p17_p5, %p11_p0 }
   0xc   :  { %21 = shalt.err (!%p18_p6)  }
   0xd   :  { %s22_s17 = scalar_lea.vmem %s5_s11, 2048  ;;  %p27_p8 = scmp.lt.s32.totalorder %s5_s11, %s5_s11 }
   0xe   :  { %p23_p7 = scmp.ne.s32.totalorder %s5_s11, %s22_s17  ;;  %p28_p9 = scmp.lt.s32.totalorder %s22_s17, %s22_s17 }
  0x10   :  { %p29_p10 = por %p28_p9, %p27_p8 }
  0x12   :  { %p30_p11 = pnand %p29_p10, %p23_p7 }
  0x14   :  { %33 = shalt.err (!%p30_p11)  }
  0x15   :  { %7 = dma.hbm_to_vmem [thread:$0]  %s2_s8, 2048, %s5_s11, [#allocation0] }
  0x16   :  { %35 = dma.done.wait [#allocation0], 2048  }
  0x17   :  { %36 = vsyncadd [#allocation0], 4294965248 }
  0x18   :  { %9 = vsyncpa [#allocation0], 1 }

// kernel: custom-call.2
= control target key start
LH: loop header
LB: loop body
LE: loop exit
PB: predicated region body
PF: predicated region fallthrough
CT: control target
= control target key end

     0   :  { %s126_s0 = inlined_call_operand.vmem [shape: f32[2,4,32,32], index: 0, kind: input, shape index: {}]   ;;  %s127_s1 = inlined_call_operand.vmem [shape: f32[2,4,32,32], index: 1, kind: input, shape index: {}]   ;;  %s128_s2 = inlined_call_operand.hbm [shape: c64[2,4,32,32], index: 2, kind: output, shape index: {}]  }
   0x1   :  { %s87_s11 = scalar_lea.hbm %s128_s2, 4096 }
   0x2   :  { %4 = vsyncpa [#allocation0], 0  ;;  %s5_s14 = sshll.u32 %s126_s0, 4  ;;  %s6_s14 = int_to_ptr.vmem [resolvable:$true] %s5_s14 }
   0x3   :  { %s18_s15 = scalar_lea.vmem %s6_s14, 4096  ;;  %p23_p1 = scmp.lt.s32.totalorder %s6_s14, %s6_s14 }
   0x4   :  { %p19_p0 = scmp.ne.s32.totalorder %s6_s14, %s18_s15  ;;  %p24_p2 = scmp.lt.s32.totalorder %s18_s15, %s18_s15 }
   0x6   :  { %p25_p3 = por %p24_p2, %p23_p1 }
   0x8   :  { %p26_p4 = pnand %p25_p3, %p19_p0 }
   0xa   :  { %29 = shalt.err (!%p26_p4)  }
   0xb   :  { %p31_p5 = scmp.ne.s32.totalorder %s128_s2, %s87_s11  ;;  %s32_s0 = scalar_lea.hbm %s128_s2, 8192 }
   0xc   :  { %p33_p6 = scmp.lt.u32.totalorder %s32_s0, %s87_s11  ;;  %p34_p7 = scmp.lt.u32.totalorder %s87_s11, %s128_s2 }
   0xe   :  { %p35_p8 = por %p34_p7, %p33_p6 }
  0x10   :  { %p36_p9 = pnand %p35_p8, %p31_p5 }
  0x12   :  { %39 = shalt.err (!%p36_p9)  }
  0x13   :  { %8 = dma.vmem_to_hbm [thread:$0]  %s6_s14, 4096, %s128_s2, [#allocation0] }
  0x14   :  { %65 = dma.done.wait [#allocation0], 4096  }
  0x15   :  { %66 = vsyncadd [#allocation0], 4294963200 }
  0x16   :  { %10 = vsyncpa [#allocation0], 1 }
  0x17   :  { %11 = vsyncpa [#allocation1], 0  ;;  %s12_s28 = sshll.u32 %s127_s1, 4  ;;  %s13_s28 = int_to_ptr.vmem [resolvable:$true] %s12_s28 }
  0x18   :  { %s40_s29 = scalar_lea.vmem %s13_s28, 4096  ;;  %p45_p11 = scmp.lt.s32.totalorder %s13_s28, %s13_s28 }
  0x19   :  { %p41_p10 = scmp.ne.s32.totalorder %s13_s28, %s40_s29  ;;  %p46_p12 = scmp.lt.s32.totalorder %s40_s29, %s40_s29 }
  0x1b   :  { %p47_p13 = por %p46_p12, %p45_p11 }
  0x1d   :  { %p48_p0 = pnand %p47_p13, %p41_p10 }
  0x1f   :  { %51 = shalt.err (!%p48_p0)  }
  0x20   :  { %p53_p1 = scmp.ne.s32.totalorder %s87_s11, %s32_s0  ;;  %p56_p2 = scmp.lt.u32.totalorder %s32_s0, %s32_s0 }
  0x22   :  { %p57_p3 = por %p56_p2, %p34_p7 }
  0x24   :  { %p59_p4 = por %p57_p3, %p33_p6 }
  0x26   :  { %p60_p5 = pnand %p59_p4, %p53_p1 }
  0x28   :  { %63 = shalt.err (!%p60_p5)  }
  0x29   :  { %15 = dma.vmem_to_hbm [thread:$0]  %s13_s28, 4096, %s87_s11, [#allocation1] }
  0x2a   :  { %67 = dma.done.wait [#allocation1], 4096  }
  0x2b   :  { %68 = vsyncadd [#allocation1], 4294963200 }
  0x2c   :  { %17 = vsyncpa [#allocation1], 1 }

// kernel: complex_upsample2d.1
= control target key start
LH: loop header
LB: loop body
LE: loop exit
PB: predicated region body
PF: predicated region fallthrough
CT: control target
= control target key end

     0   :  { %10 = vsyncpa [#allocation3], 0  ;;  %s1422_s15 = smov [#allocation2]   ;;  %s2058_s0 = inlined_call_operand.vmem [shape: f32[8,256], index: 0, kind: input, shape index: {}]   ;;  %s2059_s1 = inlined_call_operand.vmem [shape: f32[8,256], index: 1, kind: input, shape index: {}]   ;;  %s2060_s2 = inlined_call_operand.hbm [shape: f32[256,1024], index: 2, kind: input, shape index: {}]   ;;  %s2061_s3 = inlined_call_operand.vmem [shape: f32[8,1024], index: 3, kind: output, shape index: {0}]   ;;  %s2062_s4 = inlined_call_operand.vmem [shape: f32[8,1024], index: 4, kind: output, shape index: {1}]  }
   0x1   :  { %s20_s16 = sshll.u32 %s1422_s15, 4  ;;  %s1398_s19 = scalar_lea.hbm %s2060_s2, 32768  ;;  %s21_s16 = int_to_ptr.vmem [resolvable:$true] %s20_s16 }
   0x2   :  { %p1399_p0 = scmp.ne.s32.totalorder %s2060_s2, %s1398_s19  ;;  %p1402_p1 = scmp.lt.u32.totalorder %s1398_s19, %s2060_s2 }
   0x4   :  { %p1404_p2 = pnand %p1402_p1, %p1399_p0 }
   0x6   :  { %1407 = shalt.err (!%p1404_p2)
}
   0x7   :  { %s1408_s24 = scalar_lea.vmem %s21_s16, 32768  ;;  %p1413_p4 = scmp.lt.s32.totalorder %s21_s16, %s21_s16 }
   0x8   :  { %p1409_p3 = scmp.ne.s32.totalorder %s21_s16, %s1408_s24  ;;  %p1414_p5 = scmp.lt.s32.totalorder %s1408_s24, %s1408_s24 }
   0xa   :  { %p1415_p6 = por %p1414_p5, %p1413_p4 }
   0xc   :  { %p1416_p7 = pnand %p1415_p6, %p1409_p3 }
   0xe   :  { %1419 = shalt.err (!%p1416_p7)
}
   0xf   :  { %s1423_s25 = smov 1024   ;;  %s1424_s26 = smov 64  }
  0x10   :  { %26 = dma.hbm_to_vmem [thread:$0]  %s2060_s2, 32768, %s21_s16, [#allocation3], %s1423_s25, %s1423_s25, %s1424_s26  }
  0x11   :  { %1420 = dma.done.wait [#allocation3], 32768  }
  0x12   :  { %1421 = vsyncadd [#allocation3], 4294934528  ;;  %v31_v0 = vld [vmem:[#allocation2 + $0x8] sm:$0xff]  ;;  %v33_v2 = vld [vmem:[#allocation2 + $0x18] sm:$0xff] }
  0x13   :  { %v39_v1 = vld [vmem:[#allocation2 + $0x48] sm:$0xff]  ;;  %v41_v4 = vld [vmem:[#allocation2 + $0x58] sm:$0xff]  ;;  %v30_v5 = vld [vmem:[#allocation2] sm:$0xff] }
  0x14   :  { %v1462_v3 = vpack.c.bf16 %v39_v1, %v31_v0  ;;  %v38_v6 = vld [vmem:[#allocation2 + $0x40] sm:$0xff]  ;;  %v1464_v7 = vpack.c.bf16 %v41_v4, %v33_v2  ;;  %v32_v9 = vld [vmem:[#allocation2 + $0x10] sm:$0xff]  ;;  %v47_v11 = vld [vmem:[#allocation2 + $0x88] sm:$0xff] }
  0x15   :  { %v1466_v8 = vpack.c.bf16 %v38_v6, %v30_v5  ;;  %v40_v10 = vld [vmem:[#allocation2 + $0x50] sm:$0xff]  ;;  %v55_v13 = vld [vmem:[#allocation2 + $0xc8] sm:$0xff]  ;;  %v49_v14 = vld [vmem:[#allocation2 + $0x98] sm:$0xff] }
  0x16   :  { %884 = vmatprep.subr.bf16.mxu0 %v1462_v3  ;;  %v1469_v12 = vpack.c.bf16 %v40_v10, %v32_v9  ;;  %v57_v15 = vld [vmem:[#allocation2 + $0xd8] sm:$0xff]  ;;  %948 = vmatprep.subr.bf16.mxu1 %v1464_v7  ;;  %v1473_v16 = vpack.c.bf16 %v55_v13, %v47_v11  ;;  %v46_v18 = vld [vmem:[#allocation2 + $0x80] sm:$0xff]  ;;  %v48_v20 = vld [vmem:[#allocation2 + $0x90] sm:$0xff] }
  0x17   :  { %886 = vmatpush1.bf16.msra.mxu0 %v1466_v8  ;;  %v1475_v17 = vpack.c.bf16 %v57_v15, %v49_v14  ;;  %v54_v19 = vld [vmem:[#allocation2 + $0xc0] sm:$0xff]  ;;  %v56_v22 = vld [vmem:[#allocation2 + $0xd0] sm:$0xff]  ;;  %v63_v23 = vld [vmem:[#allocation2 + $0x108] sm:$0xff] }
  0x18   :  { %950 = vmatpush1.bf16.msra.mxu1 %v1469_v12  ;;  %v1478_v21 = vpack.c.bf16 %v54_v19, %v46_v18  ;;  %v71_v24 = vld [vmem:[#allocation2 + $0x148] sm:$0xff]  ;;  %888 = vmatprep.subr.bf16.mxu0 %v1473_v16  ;;  %v1482_v25 = vpack.c.bf16 %v56_v22, %v48_v20  ;;  %v65_v27 = vld [vmem:[#allocation2 + $0x118] sm:$0xff]  ;;  %v62_v29 = vld [vmem:[#allocation2 + $0x100] sm:$0xff] }
  0x19   :  { %952 = vmatprep.subr.bf16.mxu1 %v1475_v17  ;;  %v1484_v26 = vpack.c.bf16 %v71_v24, %v63_v23  ;;  %v73_v28 = vld [vmem:[#allocation2 + $0x158] sm:$0xff]  ;;  %v70_v31 = vld [vmem:[#allocation2 + $0x140] sm:$0xff]  ;;  %v64_v32 = vld [vmem:[#allocation2 + $0x110] sm:$0xff] }
  0x1a   :  { %v1486_v30 = vpack.c.bf16 %v73_v28, %v65_v27  ;;  %v72_v33 = vld [vmem:[#allocation2 + $0x150] sm:$0xff]  ;;  %v1489_v34 = vpack.c.bf16 %v70_v31, %v62_v29  ;;  %v79_v35 = vld [vmem:[#allocation2 + $0x188] sm:$0xff]  ;;  %v81_v37 = vld [vmem:[#allocation2 + $0x198] sm:$0xff] }
  0x1b   :  { %890 = vmatpush1.bf16.msra.mxu0 %v1478_v21  ;;  %v87_v36 = vld [vmem:[#allocation2 + $0x1c8] sm:$0xff]  ;;  %v1493_v38 = vpack.c.bf16 %v72_v33, %v64_v32  ;;  %v89_v40 = vld [vmem:[#allocation2 + $0x1d8] sm:$0xff]  ;;  %v78_v41 = vld [vmem:[#allocation2 + $0x180] sm:$0xff] }
  0x1c   :  { %954 = vmatpush1.bf16.msra.mxu1 %v1482_v25  ;;  %892 = vmatprep.subr.bf16.mxu0 %v1484_v26  ;;  %v1495_v39 = vpack.c.bf16 %v87_v36, %v79_v35  ;;  %v86_v42 = vld [vmem:[#allocation2 + $0x1c0] sm:$0xff]  ;;  %v1498_v43 = vpack.c.bf16 %v89_v40, %v81_v37  ;;  %v80_v44 = vld [vmem:[#allocation2 + $0x190] sm:$0xff]  ;;  %v95_v46 = vld [vmem:[#allocation2 + $0x208] sm:$0xff] }
  0x1d   :  { %956 = vmatprep.subr.bf16.mxu1 %v1486_v30  ;;  %v88_v45 = vld [vmem:[#allocation2 + $0x1d0] sm:$0xff]  ;;  %v103_v47 = vld [vmem:[#allocation2 + $0x248] sm:$0xff]  ;;  %v97_v48 = vld [vmem:[#allocation2 + $0x218] sm:$0xff]  ;;  %v1501_v50 = vpack.c.bf16 %v86_v42, %v78_v41 }
  0x1e   :  { %v105_v49 = vld [vmem:[#allocation2 + $0x258] sm:$0xff]  ;;  %v1505_v51 = vpack.c.bf16 %v88_v45, %v80_v44  ;;  %v1507_v52 = vpack.c.bf16 %v103_v47, %v95_v46  ;;  %v94_v53 = vld [vmem:[#allocation2 + $0x200] sm:$0xff]  ;;  %v96_v55 = vld [vmem:[#allocation2 + $0x210] sm:$0xff] }
  0x1f   :  { %894 = vmatpush1.bf16.msra.mxu0 %v1489_v34  ;;  %v102_v54 = vld [vmem:[#allocation2 + $0x240] sm:$0xff]  ;;  %v1510_v56 = vpack.c.bf16 %v105_v49, %v97_v48  ;;  %v104_v57 = vld [vmem:[#allocation2 + $0x250] sm:$0xff]  ;;  %v111_v58 = vld [vmem:[#allocation2 + $0x288] sm:$0xff] }
  0x20   :  { %958 = vmatpush1.bf16.msra.mxu1 %v1493_v38  ;;  %896 = vmatprep.subr.bf16.mxu0 %v1495_v39  ;;  %v119_v59 = vld [vmem:[#allocation2 + $0x2c8] sm:$0xff]  ;;  %v113_v60 = vld [vmem:[#allocation2 + $0x298] sm:$0xff]  ;;  %v1513_v62 = vpack.c.bf16 %v102_v54, %v94_v53  ;;  %v1517_v63 = vpack.c.bf16 %v104_v57, %v96_v55  ;;  %v110_v1 = vld [vmem:[#allocation2 + $0x280] sm:$0xff] }
  0x21   :  { %960 = vmatprep.subr.bf16.mxu1 %v1498_v43  ;;  %v121_v61 = vld [vmem:[#allocation2 + $0x2d8] sm:$0xff]  ;;  %v1519_v0 = vpack.c.bf16 %v119_v59, %v111_v58  ;;  %v118_v2 = vld [vmem:[#allocation2 + $0x2c0] sm:$0xff]  ;;  %v112_v4 = vld [vmem:[#allocation2 + $0x290] sm:$0xff] }
  0x22   :  { %v1522_v5 = vpack.c.bf16 %v121_v61, %v113_v60  ;;  %v120_v6 = vld [vmem:[#allocation2 + $0x2d0] sm:$0xff]  ;;  %v127_v9 = vld [vmem:[#allocation2 + $0x308] sm:$0xff]  ;;  %v129_v11 = vld [vmem:[#allocation2 + $0x318] sm:$0xff]  ;;  %v1525_v14 = vpack.c.bf16 %v118_v2, %v110_v1 }
  0x23   :  { %898 = vmatpush1.bf16.msra.mxu0 %v1501_v50  ;;  %v135_v10 = vld [vmem:[#allocation2 + $0x348] sm:$0xff]  ;;  %v137_v13 = vld [vmem:[#allocation2 + $0x358] sm:$0xff]  ;;  %v1529_v15 = vpack.c.bf16 %v120_v6, %v112_v4  ;;  %v126_v19 = vld [vmem:[#allocation2 + $0x300] sm:$0xff] }
  0x24   :  { %962 = vmatpush1.bf16.msra.mxu1 %v1505_v51  ;;  %900 = vmatprep.subr.bf16.mxu0 %v1507_v52  ;;  %v1531_v18 = vpack.c.bf16 %v135_v10, %v127_v9  ;;  %v134_v20 = vld [vmem:[#allocation2 + $0x340] sm:$0xff]  ;;  %v128_v22 = vld [vmem:[#allocation2 + $0x310] sm:$0xff]  ;;  %v1534_v23 = vpack.c.bf16 %v137_v13, %v129_v11  ;;  %v143_v27 = vld [vmem:[#allocation2 + $0x388] sm:$0xff] }
  0x25   :  { %964 = vmatprep.subr.bf16.mxu1 %v1510_v56  ;;  %v136_v24 = vld [vmem:[#allocation2 + $0x350] sm:$0xff]  ;;  %v151_v28 = vld [vmem:[#allocation2 + $0x3c8] sm:$0xff]  ;;  %v145_v29 = vld [vmem:[#allocation2 + $0x398] sm:$0xff]  ;;  %v1537_v32 = vpack.c.bf16 %v134_v20, %v126_v19 }
  0x26   :  { %v153_v31 = vld [vmem:[#allocation2 + $0x3d8] sm:$0xff]  ;;  %v1541_v33 = vpack.c.bf16 %v136_v24, %v128_v22  ;;  %v1543_v35 = vpack.c.bf16 %v151_v28, %v143_v27  ;;  %v142_v36 = vld [vmem:[#allocation2 + $0x380] sm:$0xff]  ;;  %v144_v40 = vld [vmem:[#allocation2 + $0x390] sm:$0xff] }
  0x27   :  { %902 = vmatpush1.bf16.msra.mxu0 %v1513_v62  ;;  %v150_v37 = vld [vmem:[#allocation2 + $0x3c0] sm:$0xff]  ;;  %v1546_v41 = vpack.c.bf16 %v153_v31, %v145_v29  ;;  %v152_v42 = vld [vmem:[#allocation2 + $0x3d0] sm:$0xff]  ;;  %v159_v44 = vld [vmem:[#allocation2 + $0x408] sm:$0xff] }
  0x28   :  { %966 = vmatpush1.bf16.msra.mxu1 %v1517_v63  ;;  %904 = vmatprep.subr.bf16.mxu0 %v1519_v0  ;;  %v167_v45 = vld [vmem:[#allocation2 + $0x448] sm:$0xff]  ;;  %v161_v46 = vld [vmem:[#allocation2 + $0x418] sm:$0xff]  ;;  %v1549_v48 = vpack.c.bf16 %v150_v37, %v142_v36  ;;  %v1553_v49 = vpack.c.bf16 %v152_v42, %v144_v40  ;;  %v158_v54 = vld [vmem:[#allocation2 + $0x400] sm:$0xff] }
  0x29   :  { %968 = vmatprep.subr.bf16.mxu1 %v1522_v5  ;;  %v169_v47 = vld [vmem:[#allocation2 + $0x458] sm:$0xff]  ;;  %v1555_v53 = vpack.c.bf16 %v167_v45, %v159_v44  ;;  %v166_v55 = vld [vmem:[#allocation2 + $0x440] sm:$0xff]  ;;  %v160_v57 = vld [vmem:[#allocation2 + $0x410] sm:$0xff] }
  0x2a   :  { %v1558_v58 = vpack.c.bf16 %v169_v47, %v161_v46  ;;  %v168_v59 = vld [vmem:[#allocation2 + $0x450] sm:$0xff]  ;;  %v175_v60 = vld [vmem:[#allocation2 + $0x488] sm:$0xff]  ;;  %v177_v1 = vld [vmem:[#allocation2 + $0x498] sm:$0xff]  ;;  %v1561_v4 = vpack.c.bf16 %v166_v55, %v158_v54 }
  0x2b   :  { %906 = vmatpush1.bf16.msra.mxu0 %v1525_v14  ;;  %v183_v61 = vld [vmem:[#allocation2 + $0x4c8] sm:$0xff]  ;;  %v185_v2 = vld [vmem:[#allocation2 + $0x4d8] sm:$0xff]  ;;  %v1565_v6 = vpack.c.bf16 %v168_v59, %v160_v57  ;;  %v174_v10 = vld [vmem:[#allocation2 + $0x480] sm:$0xff] }
  0x2c   :  { %970 = vmatpush1.bf16.msra.mxu1 %v1529_v15  ;;  %908 = vmatprep.subr.bf16.mxu0 %v1531_v18  ;;  %v1567_v9 = vpack.c.bf16 %v183_v61, %v175_v60  ;;  %v182_v11 = vld [vmem:[#allocation2 + $0x4c0] sm:$0xff]  ;;  %v176_v13 = vld [vmem:[#allocation2 + $0x490] sm:$0xff]  ;;  %v1570_v19 = vpack.c.bf16 %v185_v2, %v177_v1  ;;  %v191_v22 = vld [vmem:[#allocation2 + $0x508] sm:$0xff] }
  0x2d   :  { %972 = vmatprep.subr.bf16.mxu1 %v1534_v23  ;;  %v184_v20 = vld [vmem:[#allocation2 + $0x4d0] sm:$0xff]  ;;  %v199_v24 = vld [vmem:[#allocation2 + $0x548] sm:$0xff]  ;;  %v193_v27 = vld [vmem:[#allocation2 + $0x518] sm:$0xff]  ;;  %v1573_v29 = vpack.c.bf16 %v182_v11, %v174_v10 }
  0x2e   :  { %v201_v28 = vld [vmem:[#allocation2 + $0x558] sm:$0xff]  ;;  %v1577_v31 = vpack.c.bf16 %v184_v20, %v176_v13  ;;  %v1579_v36 = vpack.c.bf16 %v199_v24, %v191_v22  ;;  %v190_v37 = vld [vmem:[#allocation2 + $0x500] sm:$0xff]  ;;  %v192_v42 = vld [vmem:[#allocation2 + $0x510] sm:$0xff] }
  0x2f   :  { %910 = vmatpush1.bf16.msra.mxu0 %v1537_v32  ;;  %v198_v40 = vld [vmem:[#allocation2 + $0x540] sm:$0xff]  ;;  %v1582_v44 = vpack.c.bf16 %v201_v28, %v193_v27  ;;  %v200_v45 = vld [vmem:[#allocation2 + $0x550] sm:$0xff]  ;;  %v207_v46 = vld [vmem:[#allocation2 + $0x588] sm:$0xff] }
  0x30   :  { %974 = vmatpush1.bf16.msra.mxu1 %v1541_v33  ;;  %912 = vmatprep.subr.bf16.mxu0 %v1543_v35  ;;  %v215_v47 = vld [vmem:[#allocation2 + $0x5c8] sm:$0xff]  ;;  %v209_v54 = vld [vmem:[#allocation2 + $0x598] sm:$0xff]  ;;  %v1585_v57 = vpack.c.bf16 %v198_v40, %v190_v37  ;;  %v206_v59 = vld [vmem:[#allocation2 + $0x580] sm:$0xff]  ;;  %v1589_v60 = vpack.c.bf16 %v200_v45, %v192_v42 }
  0x31   :  { %976 = vmatprep.subr.bf16.mxu1 %v1546_v41  ;;  %2138 = vst [vmem:[#allocation5_spill] sm:$0xff] %v1582_v44  ;;  %v217_v55 = vld [vmem:[#allocation2 + $0x5d8] sm:$0xff]  ;;  %v1591_v61 = vpack.c.bf16 %v215_v47, %v207_v46  ;;  %v214_v1 = vld [vmem:[#allocation2 + $0x5c0] sm:$0xff]  ;;  %v208_v2 = vld [vmem:[#allocation2 + $0x590] sm:$0xff] }
  0x32   :  { %2139 = vst [vmem:[#allocation6_spill] sm:$0xff] %v1585_v57  ;;  %2140 = vst [vmem:[#allocation7_spill] sm:$0xff] %v1589_v60  ;;  %v216_v10 = vld [vmem:[#allocation2 + $0x5d0] sm:$0xff]  ;;  %v1594_v11 = vpack.c.bf16 %v217_v55, %v209_v54  ;;  %v223_v13 = vld [vmem:[#allocation2 + $0x608] sm:$0xff]  ;;  %v1604_v28 = vpack.c.bf16 %v214_v1, %v206_v59 }
  0x33   :  { %914 = vmatpush1.bf16.msra.mxu0 %v1549_v48  ;;  %2141 = vst [vmem:[#allocation8_spill] sm:$0xff] %v1591_v61  ;;  %v231_v20 = vld [vmem:[#allocation2 + $0x648] sm:$0xff]  ;;  %v225_v24 = vld [vmem:[#allocation2 + $0x618] sm:$0xff]  ;;  %v1608_v37 = vpack.c.bf16 %v216_v10, %v208_v2  ;;  %v222_v42 = vld [vmem:[#allocation2 + $0x600] sm:$0xff] }
  0x34   :  { %978 = vmatpush1.bf16.msra.mxu1 %v1553_v49  ;;  %916 = vmatprep.subr.bf16.mxu0 %v1555_v53  ;;  %2142 = vst [vmem:[#allocation9_spill] sm:$0xff] %v1594_v11  ;;  %v1599_v22 = vld [vmem:[%s2058_s0 + $0x8] sm:$0xff]  ;;  %v233_v27 = vld [vmem:[#allocation2 + $0x658] sm:$0xff]  ;;  %2143 = vst [vmem:[#allocation10_spill] sm:$0xff] %v1604_v28  ;;  %v1610_v40 = vpack.c.bf16 %v231_v20, %v223_v13 }
  0x35   :  { %980 = vmatprep.subr.bf16.mxu1 %v1558_v58  ;;  %352 = vmatprep.mubr.f32.mxu0 %v1599_v22  ;;  %2144 = vst [vmem:[#allocation11_spill] sm:$0xff] %v1608_v37  ;;  %v230_v45 = vld [vmem:[#allocation2 + $0x640] sm:$0xff]  ;;  %v224_v46 = vld [vmem:[#allocation2 + $0x610] sm:$0xff]  ;;  %v1613_v47 = vpack.c.bf16 %v233_v27, %v225_v24  ;;  %v239_v55 = vld [vmem:[#allocation2 + $0x688] sm:$0xff] }
  0x36   :  { %423 = vmatprep.mubr.f32.mxu1 %v1599_v22  ;;  %2145 = vst [vmem:[#allocation12_spill] sm:$0xff] %v1610_v40  ;;  %v232_v54 = vld [vmem:[#allocation2 + $0x650] sm:$0xff]  ;;  %v241_v59 = vld [vmem:[#allocation2 + $0x698] sm:$0xff]  ;;  %v238_v13 = vld [vmem:[#allocation2 + $0x680] sm:$0xff] }
  0x37   :  { %918 = vmatpush1.bf16.msra.mxu0 %v1561_v4  ;;  %2146 = vst [vmem:[#allocation13_spill] sm:$0xff] %v1613_v47  ;;  %v249_v1 = vld [vmem:[#allocation2 + $0x6d8] sm:$0xff]  ;;  %v1620_v2 = vpack.c.bf16 %v232_v54, %v224_v46  ;;  %v246_v20 = vld [vmem:[#allocation2 + $0x6c0] sm:$0xff]  ;;  %v240_v24 = vld [vmem:[#allocation2 + $0x690] sm:$0xff] }
  0x38   :  { %982 = vmatpush1.bf16.msra.mxu1 %v1565_v6  ;;  %920 = vmatprep.subr.bf16.mxu0 %v1567_v9  ;;  %v1625_v27 = vpack.c.bf16 %v249_v1, %v241_v59  ;;  %v254_v54 = vld [vmem:[#allocation2 + $0x700] sm:$0xff]  ;;  %v256_v59 = vld [vmem:[#allocation2 + $0x710] sm:$0xff] }
  0x39   :  { %984 = vmatprep.subr.bf16.mxu1 %v1570_v19  ;;  %2148 = vst [vmem:[#allocation15_spill] sm:$0xff] %v1620_v2 }
  0x3a   :  { %2150 = vst [vmem:[#allocation17_spill] sm:$0xff] %v1625_v27 }
  0x3b   :  { %922 = vmatpush1.bf16.msra.mxu0 %v1573_v29 }
  0x3c   :  { %986 = vmatpush1.bf16.msra.mxu1 %v1577_v31  ;;  %924 = vmatprep.subr.bf16.mxu0 %v1579_v36 }
  0x3d   :  { %988 = vmatprep.subr.bf16.mxu1 %v1582_v44  ;;  %v75_v44 = vld [vmem:[#allocation2 + $0x168] sm:$0xff] }
  0x3f   :  { %926 = vmatpush1.bf16.msra.mxu0 %v1585_v57  ;;  %v247_v57 = vld [vmem:[#allocation2 + $0x6c8] sm:$0xff] }
  0x40   :  { %990 = vmatpush1.bf16.msra.mxu1 %v1589_v60  ;;  %928 = vmatprep.subr.bf16.mxu0 %v1591_v61  ;;  %v1616_v60 = vpack.c.bf16 %v230_v45, %v222_v42  ;;  %v1622_v10 = vpack.c.bf16 %v247_v57, %v239_v55  ;;  %v255_v61 = vld [vmem:[#allocation2 + $0x708] sm:$0xff]  ;;  %v257_v42 = vld [vmem:[#allocation2 + $0x718] sm:$0xff]  ;;  %v262_v55 = vld [vmem:[#allocation2 + $0x740] sm:$0xff] }
  0x41   :  { %992 = vmatprep.subr.bf16.mxu1 %v1594_v11  ;;  %v248_v11 = vld [vmem:[#allocation2 + $0x6d0] sm:$0xff]  ;;  %v265_v45 = vld [vmem:[#allocation2 + $0x758] sm:$0xff] }
  0x42   :  { %2147 = vst [vmem:[#allocation14_spill] sm:$0xff] %v1616_v60  ;;  %2149 = vst [vmem:[#allocation16_spill] sm:$0xff] %v1622_v10  ;;  %v1632_v57 = vpack.c.bf16 %v248_v11, %v240_v24  ;;  %v1637_v1 = vpack.c.bf16 %v265_v45, %v257_v42  ;;  %v278_v24 = vld [vmem:[#allocation2 + $0x7c0] sm:$0xff]  ;;  %v272_v42 = vld [vmem:[#allocation2 + $0x790] sm:$0xff] }
  0x43   :  { %930 = vmatpush1.bf16.msra.mxu0 %v1604_v28  ;;  %v263_v28 = vld [vmem:[#allocation2 + $0x748] sm:$0xff] }
  0x44   :  { %994 = vmatpush1.bf16.msra.mxu1 %v1608_v37  ;;  %932 = vmatprep.subr.bf16.mxu0 %v1610_v40  ;;  %v1628_v37 = vpack.c.bf16 %v246_v20, %v238_v13  ;;  %2152 = vst [vmem:[#allocation19_spill] sm:$0xff] %v1632_v57  ;;  %v1634_v46 = vpack.c.bf16 %v263_v28, %v255_v61  ;;  %2154 = vst [vmem:[#allocation21_spill] sm:$0xff] %v1637_v1  ;;  %v271_v40 = vld [vmem:[#allocation2 + $0x788] sm:$0xff]  ;;  %v273_v13 = vld [vmem:[#allocation2 + $0x798] sm:$0xff] }
  0x45   :  { %996 = vmatprep.subr.bf16.mxu1 %v1613_v47  ;;  %v264_v47 = vld [vmem:[#allocation2 + $0x750] sm:$0xff]  ;;  %v281_v20 = vld [vmem:[#allocation2 + $0x7d8] sm:$0xff]  ;;  %v270_v28 = vld [vmem:[#allocation2 + $0x780] sm:$0xff] }
  0x46   :  { %2151 = vst [vmem:[#allocation18_spill] sm:$0xff] %v1628_v37  ;;  %2153 = vst [vmem:[#allocation20_spill] sm:$0xff] %v1634_v46  ;;  %v1644_v61 = vpack.c.bf16 %v264_v47, %v256_v59  ;;  %v1649_v45 = vpack.c.bf16 %v281_v20, %v273_v13  ;;  %v34_v47 = vld [vmem:[#allocation2 + $0x20] sm:$0xff]  ;;  %v36_v13 = vld [vmem:[#allocation2 + $0x30] sm:$0xff] }
  0x47   :  { %934 = vmatpush1.bf16.msra.mxu0 %v1616_v60  ;;  %v279_v60 = vld [vmem:[#allocation2 + $0x7c8] sm:$0xff]  ;;  %v42_v59 = vld [vmem:[#allocation2 + $0x60] sm:$0xff] }
  0x48   :  { %998 = vmatpush1.bf16.msra.mxu1 %v1620_v2  ;;  %936 = vmatprep.subr.bf16.mxu0 %v1622_v10  ;;  %v1640_v2 = vpack.c.bf16 %v262_v55, %v254_v54  ;;  %2156 = vst [vmem:[#allocation23_spill] sm:$0xff] %v1644_v61  ;;  %v1646_v11 = vpack.c.bf16 %v279_v60, %v271_v40  ;;  %2158 = vst [vmem:[#allocation25_spill] sm:$0xff] %v1649_v45  ;;  %v35_v10 = vld [vmem:[#allocation2 + $0x28] sm:$0xff]  ;;  %v37_v54 = vld [vmem:[#allocation2 + $0x38] sm:$0xff] }
  0x49   :  { %1000 = vmatprep.subr.bf16.mxu1 %v1625_v27  ;;  %v280_v27 = vld [vmem:[#allocation2 + $0x7d0] sm:$0xff]  ;;  %v45_v55 = vld [vmem:[#allocation2 + $0x78] sm:$0xff] }
  0x4a   :  { %2155 = vst [vmem:[#allocation22_spill] sm:$0xff] %v1640_v2  ;;  %2157 = vst [vmem:[#allocation24_spill] sm:$0xff] %v1646_v11  ;;  %v1656_v60 = vpack.c.bf16 %v280_v27, %v272_v42  ;;  %v1661_v20 = vpack.c.bf16 %v45_v55, %v37_v54  ;;  %v1667_v27 = vld [vmem:[%s2058_s0] sm:$0xff] }
  0x4b   :  { %938 = vmatpush1.bf16.msra.mxu0 %v1628_v37  ;;  %v43_v37 = vld [vmem:[#allocation2 + $0x68] sm:$0xff]  ;;  %v50_v54 = vld [vmem:[#allocation2 + $0xa0] sm:$0xff] }
  0x4c   :  { %1002 = vmatpush1.bf16.msra.mxu1 %v1632_v57  ;;  %940 = vmatprep.subr.bf16.mxu0 %v1634_v46  ;;  %v1652_v57 = vpack.c.bf16 %v278_v24, %v270_v28  ;;  %2160 = vst [vmem:[#allocation27_spill] sm:$0xff] %v1656_v60  ;;  %v1658_v40 = vpack.c.bf16 %v43_v37, %v35_v10  ;;  %2162 = vst [vmem:[#allocation29_spill] sm:$0xff] %v1661_v20  ;;  %v51_v46 = vld [vmem:[#allocation2 + $0xa8] sm:$0xff]  ;;  %v53_v28 = vld [vmem:[#allocation2 + $0xb8] sm:$0xff] }
  0x4d   :  { %1004 = vmatprep.subr.bf16.mxu1 %v1637_v1  ;;  %v44_v1 = vld [vmem:[#allocation2 + $0x70] sm:$0xff]  ;;  %v61_v24 = vld [vmem:[#allocation2 + $0xf8] sm:$0xff]  ;;  %v1669_v37 = vpack.c.bf16 %v42_v59, %v34_v47  ;;  %v58_v55 = vld [vmem:[#allocation2 + $0xe0] sm:$0xff] }
  0x4e   :  { %2159 = vst [vmem:[#allocation26_spill] sm:$0xff] %v1652_v57  ;;  %2161 = vst [vmem:[#allocation28_spill] sm:$0xff] %v1658_v40  ;;  %v1673_v10 = vpack.c.bf16 %v44_v1, %v36_v13  ;;  %v69_v47 = vld [vmem:[#allocation2 + $0x138] sm:$0xff]  ;;  %v66_v13 = vld [vmem:[#allocation2 + $0x120] sm:$0xff] }
  0x4f   :  { %942 = vmatpush1.bf16.msra.mxu0 %v1640_v2  ;;  %v59_v2 = vld [vmem:[#allocation2 + $0xe8] sm:$0xff]  ;;  %2163 = vst [vmem:[#allocation30_spill] sm:$0xff] %v1669_v37  ;;  %v77_v59 = vld [vmem:[#allocation2 + $0x178] sm:$0xff] }
  0x50   :  { %1006 = vmatpush1.bf16.msra.mxu1 %v1644_v61  ;;  %944 = vmatprep.subr.bf16.mxu0 %v1646_v11  ;;  %v1675_v42 = vpack.c.bf16 %v59_v2, %v51_v46  ;;  %v60_v11 = vld [vmem:[#allocation2 + $0xf0] sm:$0xff]  ;;  %v67_v61 = vld [vmem:[#allocation2 + $0x128] sm:$0xff]  ;;  %v1683_v2 = vpack.c.bf16 %v58_v55, %v50_v54  ;;  %v85_v54 = vld [vmem:[#allocation2 + $0x1b8] sm:$0xff] }
  0x51   :  { %1008 = vmatprep.subr.bf16.mxu1 %v1649_v45  ;;  %v52_v45 = vld [vmem:[#allocation2 + $0xb0] sm:$0xff]  ;;  %v1689_v1 = vpack.c.bf16 %v75_v44, %v67_v61  ;;  %v93_v55 = vld [vmem:[#allocation2 + $0x1f8] sm:$0xff] }
  0x52   :  { %2164 = vst [vmem:[#allocation31_spill] sm:$0xff] %v1675_v42  ;;  %2166 = vst [vmem:[#allocation33_spill] sm:$0xff] %v1683_v2  ;;  %v1687_v46 = vpack.c.bf16 %v60_v11, %v52_v45  ;;  %v82_v45 = vld [vmem:[#allocation2 + $0x1a0] sm:$0xff] }
  0x53   :  { %946 = vmatpush1.bf16.msra.mxu0 %v1652_v57  ;;  %v1678_v57 = vpack.c.bf16 %v61_v24, %v53_v28  ;;  %2168 = vst [vmem:[#allocation35_spill] sm:$0xff] %v1689_v1  ;;  %v74_v28 = vld [vmem:[#allocation2 + $0x160] sm:$0xff]  ;;  %v68_v24 = vld [vmem:[#allocation2 + $0x130] sm:$0xff] }
  0x54   :  { %1010 = vmatpush1.bf16.msra.mxu1 %v1656_v60  ;;  %1012 = vmatprep.subr.bf16.mxu0 %v1658_v40  ;;  %2167 = vst [vmem:[#allocation34_spill] sm:$0xff] %v1687_v46  ;;  %v76_v40 = vld [vmem:[#allocation2 + $0x170] sm:$0xff]  ;;  %v83_v60 = vld [vmem:[#allocation2 + $0x1a8] sm:$0xff]  ;;  %v1697_v44 = vpack.c.bf16 %v74_v28, %v66_v13  ;;  %v101_v13 = vld [vmem:[#allocation2 + $0x238] sm:$0xff] }
  0x55   :  { %1076 = vmatprep.subr.bf16.mxu1 %v1661_v20  ;;  %2165 = vst [vmem:[#allocation32_spill] sm:$0xff] %v1678_v57  ;;  %v1692_v20 = vpack.c.bf16 %v77_v59, %v69_v47  ;;  %v1701_v61 = vpack.c.bf16 %v76_v40, %v68_v24  ;;  %v90_v47 = vld [vmem:[#allocation2 + $0x1e0] sm:$0xff]  ;;  %v84_v59 = vld [vmem:[#allocation2 + $0x1b0] sm:$0xff]  ;;  %v109_v28 = vld [vmem:[#allocation2 + $0x278] sm:$0xff] }
  0x56   :  { %353 = vmatmul.mubr.f32.vlgmr.msra.gmra.mrb[0].mxu0 %v1667_v27  ;;  %2170 = vst [vmem:[#allocation37_spill] sm:$0xff] %v1697_v44  ;;  %v106_v24 = vld [vmem:[#allocation2 + $0x260] sm:$0xff] }
  0x57   :  { %424 = vmatmul.mubr.f32.vlgmr.msra.gmra.mrb[0].mxu1 %v1667_v27  ;;  %1014 = vmatpush1.bf16.msra.mxu0 %v1669_v37  ;;  %2169 = vst [vmem:[#allocation36_spill] sm:$0xff] %v1692_v20  ;;  %v91_v37 = vld [vmem:[#allocation2 + $0x1e8] sm:$0xff]  ;;  %2171 = vst [vmem:[#allocation38_spill] sm:$0xff] %v1701_v61 }
  0x58   :  { %1078 = vmatpush1.bf16.msra.mxu1 %v1673_v10  ;;  %1016 = vmatprep.subr.bf16.mxu0 %v1675_v42  ;;  %v1703_v11 = vpack.c.bf16 %v91_v37, %v83_v60  ;;  %v99_v42 = vld [vmem:[#allocation2 + $0x228] sm:$0xff]  ;;  %v98_v37 = vld [vmem:[#allocation2 + $0x220] sm:$0xff] }
  0x59   :  { %1080 = vmatprep.subr.bf16.mxu1 %v1678_v57  ;;  %494 = vmatprep.mubr.f32.mxu0 %v1599_v22  ;;  %v1706_v57 = vpack.c.bf16 %v93_v55, %v85_v54  ;;  %v100_v54 = vld [vmem:[#allocation2 + $0x230] sm:$0xff]  ;;  %v1718_v55 = vpack.c.bf16 %v109_v28, %v101_v13 }
  0x5a   :  { %565 = vmatprep.mubr.f32.mxu1 %v1599_v22  ;;  %2172 = vst [vmem:[#allocation39_spill] sm:$0xff] %v1703_v11  ;;  %v92_v22 = vld [vmem:[#allocation2 + $0x1f0] sm:$0xff] }
  0x5b   :  { %1018 = vmatpush1.bf16.msra.mxu0 %v1683_v2  ;;  %2173 = vst [vmem:[#allocation40_spill] sm:$0xff] %v1706_v57  ;;  %v107_v2 = vld [vmem:[#allocation2 + $0x268] sm:$0xff]  ;;  %v1713_v60 = vpack.c.bf16 %v92_v22, %v84_v59  ;;  %2177 = vst [vmem:[#allocation44_spill] sm:$0xff] %v1718_v55  ;;  %v114_v59 = vld [vmem:[#allocation2 + $0x2a0] sm:$0xff] }
  0x5c   :  { %1082 = vmatpush1.bf16.msra.mxu1 %v1687_v46  ;;  %1020 = vmatprep.subr.bf16.mxu0 %v1689_v1  ;;  %v1709_v46 = vpack.c.bf16 %v90_v47, %v82_v45  ;;  %v1715_v40 = vpack.c.bf16 %v107_v2, %v99_v42  ;;  %v115_v1 = vld [vmem:[#allocation2 + $0x2a8] sm:$0xff]  ;;  %v117_v45 = vld [vmem:[#allocation2 + $0x2b8] sm:$0xff]  ;;  %v122_v22 = vld [vmem:[#allocation2 + $0x2e0] sm:$0xff] }
  0x5d   :  { %1084 = vmatprep.subr.bf16.mxu1 %v1692_v20  ;;  %2175 = vst [vmem:[#allocation42_spill] sm:$0xff] %v1713_v60  ;;  %v108_v20 = vld [vmem:[#allocation2 + $0x270] sm:$0xff]  ;;  %v125_v47 = vld [vmem:[#allocation2 + $0x2f8] sm:$0xff] }
  0x5e   :  { %2174 = vst [vmem:[#allocation41_spill] sm:$0xff] %v1709_v46  ;;  %2176 = vst [vmem:[#allocation43_spill] sm:$0xff] %v1715_v40  ;;  %v1725_v42 = vpack.c.bf16 %v108_v20, %v100_v54  ;;  %v116_v13 = vld [vmem:[#allocation2 + $0x2b0] sm:$0xff]  ;;  %v1730_v28 = vpack.c.bf16 %v125_v47, %v117_v45  ;;  %v138_v54 = vld [vmem:[#allocation2 + $0x360] sm:$0xff] }
  0x5f   :  { %1022 = vmatpush1.bf16.msra.mxu0 %v1697_v44  ;;  %v123_v44 = vld [vmem:[#allocation2 + $0x2e8] sm:$0xff]  ;;  %v132_v45 = vld [vmem:[#allocation2 + $0x330] sm:$0xff] }
  0x60   :  { %1086 = vmatpush1.bf16.msra.mxu1 %v1701_v61  ;;  %1024 = vmatprep.subr.bf16.mxu0 %v1703_v11  ;;  %v1721_v61 = vpack.c.bf16 %v106_v24, %v98_v37  ;;  %2179 = vst [vmem:[#allocation46_spill] sm:$0xff] %v1725_v42  ;;  %v1727_v2 = vpack.c.bf16 %v123_v44, %v115_v1  ;;  %2181 = vst [vmem:[#allocation48_spill] sm:$0xff] %v1730_v28  ;;  %v131_v11 = vld [vmem:[#allocation2 + $0x328] sm:$0xff]  ;;  %v133_v37 = vld [vmem:[#allocation2 + $0x338] sm:$0xff] }
  0x61   :  { %1088 = vmatprep.subr.bf16.mxu1 %v1706_v57  ;;  %v124_v57 = vld [vmem:[#allocation2 + $0x2f0] sm:$0xff]  ;;  %v141_v24 = vld [vmem:[#allocation2 + $0x378] sm:$0xff]  ;;  %v130_v44 = vld [vmem:[#allocation2 + $0x320] sm:$0xff] }
  0x62   :  { %2178 = vst [vmem:[#allocation45_spill] sm:$0xff] %v1721_v61  ;;  %2180 = vst [vmem:[#allocation47_spill] sm:$0xff] %v1727_v2  ;;  %v1737_v20 = vpack.c.bf16 %v124_v57, %v116_v13  ;;  %v1742_v47 = vpack.c.bf16 %v141_v24, %v133_v37  ;;  %v154_v13 = vld [vmem:[#allocation2 + $0x3e0] sm:$0xff]  ;;  %v148_v37 = vld [vmem:[#allocation2 + $0x3b0] sm:$0xff] }
  0x63   :  { %1026 = vmatpush1.bf16.msra.mxu0 %v1709_v46  ;;  %v139_v46 = vld [vmem:[#allocation2 + $0x368] sm:$0xff] }
  0x64   :  { %1090 = vmatpush1.bf16.msra.mxu1 %v1713_v60  ;;  %1028 = vmatprep.subr.bf16.mxu0 %v1715_v40  ;;  %v1733_v60 = vpack.c.bf16 %v122_v22, %v114_v59  ;;  %2183 = vst [vmem:[#allocation50_spill] sm:$0xff] %v1737_v20  ;;  %v1739_v1 = vpack.c.bf16 %v139_v46, %v131_v11  ;;  %2185 = vst [vmem:[#allocation52_spill] sm:$0xff] %v1742_v47  ;;  %v147_v40 = vld [vmem:[#allocation2 + $0x3a8] sm:$0xff]  ;;  %v149_v59 = vld [vmem:[#allocation2 + $0x3b8] sm:$0xff] }
  0x65   :  { %1092 = vmatprep.subr.bf16.mxu1 %v1718_v55  ;;  %v140_v55 = vld [vmem:[#allocation2 + $0x370] sm:$0xff]  ;;  %v157_v22 = vld [vmem:[#allocation2 + $0x3f8] sm:$0xff]  ;;  %v146_v11 = vld [vmem:[#allocation2 + $0x3a0] sm:$0xff] }
  0x66   :  { %2182 = vst [vmem:[#allocation49_spill] sm:$0xff] %v1733_v60  ;;  %2184 = vst [vmem:[#allocation51_spill] sm:$0xff] %v1739_v1  ;;  %v1749_v57 = vpack.c.bf16 %v140_v55, %v132_v45  ;;  %v1754_v24 = vpack.c.bf16 %v157_v22, %v149_v59  ;;  %v162_v55 = vld [vmem:[#allocation2 + $0x420] sm:$0xff]  ;;  %v164_v59 = vld [vmem:[#allocation2 + $0x430] sm:$0xff] }
  0x67   :  { %1030 = vmatpush1.bf16.msra.mxu0 %v1721_v61  ;;  %v155_v61 = vld [vmem:[#allocation2 + $0x3e8] sm:$0xff]  ;;  %v170_v45 = vld [vmem:[#allocation2 + $0x460] sm:$0xff] }
  0x68   :  { %1094 = vmatpush1.bf16.msra.mxu1 %v1725_v42  ;;  %1032 = vmatprep.subr.bf16.mxu0 %v1727_v2  ;;  %v1745_v42 = vpack.c.bf16 %v138_v54, %v130_v44  ;;  %2187 = vst [vmem:[#allocation54_spill] sm:$0xff] %v1749_v57  ;;  %v1751_v46 = vpack.c.bf16 %v155_v61, %v147_v40  ;;  %2189 = vst [vmem:[#allocation56_spill] sm:$0xff] %v1754_v24  ;;  %v163_v2 = vld [vmem:[#allocation2 + $0x428] sm:$0xff]  ;;  %v165_v44 = vld [vmem:[#allocation2 + $0x438] sm:$0xff] }
  0x69   :  { %1096 = vmatprep.subr.bf16.mxu1 %v1730_v28  ;;  %v156_v28 = vld [vmem:[#allocation2 + $0x3f0] sm:$0xff]  ;;  %v173_v54 = vld [vmem:[#allocation2 + $0x478] sm:$0xff] }
  0x6a   :  { %2186 = vst [vmem:[#allocation53_spill] sm:$0xff] %v1745_v42  ;;  %2188 = vst [vmem:[#allocation55_spill] sm:$0xff] %v1751_v46  ;;  %v1761_v61 = vpack.c.bf16 %v156_v28, %v148_v37  ;;  %v1766_v22 = vpack.c.bf16 %v173_v54, %v165_v44  ;;  %v178_v28 = vld [vmem:[#allocation2 + $0x4a0] sm:$0xff]  ;;  %v180_v44 = vld [vmem:[#allocation2 + $0x4b0] sm:$0xff] }
  0x6b   :  { %1034 = vmatpush1.bf16.msra.mxu0 %v1733_v60  ;;  %v171_v60 = vld [vmem:[#allocation2 + $0x468] sm:$0xff]  ;;  %v186_v37 = vld [vmem:[#allocation2 + $0x4e0] sm:$0xff] }
  0x6c   :  { %1098 = vmatpush1.bf16.msra.mxu1 %v1737_v20  ;;  %1036 = vmatprep.subr.bf16.mxu0 %v1739_v1  ;;  %v1757_v20 = vpack.c.bf16 %v154_v13, %v146_v11  ;;  %2191 = vst [vmem:[#allocation58_spill] sm:$0xff] %v1761_v61  ;;  %v1763_v40 = vpack.c.bf16 %v171_v60, %v163_v2  ;;  %2193 = vst [vmem:[#allocation60_spill] sm:$0xff] %v1766_v22  ;;  %v179_v1 = vld [vmem:[#allocation2 + $0x4a8] sm:$0xff]  ;;  %v181_v11 = vld [vmem:[#allocation2 + $0x4b8] sm:$0xff] }
  0x6d   :  { %1100 = vmatprep.subr.bf16.mxu1 %v1742_v47  ;;  %v172_v47 = vld [vmem:[#allocation2 + $0x470] sm:$0xff]  ;;  %v189_v13 = vld [vmem:[#allocation2 + $0x4f8] sm:$0xff] }
  0x6e   :  { %2190 = vst [vmem:[#allocation57_spill] sm:$0xff] %v1757_v20  ;;  %2192 = vst [vmem:[#allocation59_spill] sm:$0xff] %v1763_v40  ;;  %v1773_v60 = vpack.c.bf16 %v172_v47, %v164_v59  ;;  %v1778_v54 = vpack.c.bf16 %v189_v13, %v181_v11  ;;  %v194_v47 = vld [vmem:[#allocation2 + $0x520] sm:$0xff]  ;;  %v196_v11 = vld [vmem:[#allocation2 + $0x530] sm:$0xff] }
  0x6f   :  { %1038 = vmatpush1.bf16.msra.mxu0 %v1745_v42  ;;  %v187_v42 = vld [vmem:[#allocation2 + $0x4e8] sm:$0xff]  ;;  %v202_v59 = vld [vmem:[#allocation2 + $0x560] sm:$0xff] }
  0x70   :  { %1102 = vmatpush1.bf16.msra.mxu1 %v1749_v57  ;;  %1040 = vmatprep.subr.bf16.mxu0 %v1751_v46  ;;  %v1769_v57 = vpack.c.bf16 %v170_v45, %v162_v55  ;;  %2195 = vst [vmem:[#allocation62_spill] sm:$0xff] %v1773_v60  ;;  %v1775_v2 = vpack.c.bf16 %v187_v42, %v179_v1  ;;  %2197 = vst [vmem:[#allocation64_spill] sm:$0xff] %v1778_v54  ;;  %v195_v46 = vld [vmem:[#allocation2 + $0x528] sm:$0xff]  ;;  %v197_v55 = vld [vmem:[#allocation2 + $0x538] sm:$0xff] }
  0x71   :  { %1104 = vmatprep.subr.bf16.mxu1 %v1754_v24  ;;  %v188_v24 = vld [vmem:[#allocation2 + $0x4f0] sm:$0xff]  ;;  %v205_v45 = vld [vmem:[#allocation2 + $0x578] sm:$0xff] }
  0x72   :  { %2194 = vst [vmem:[#allocation61_spill] sm:$0xff] %v1769_v57  ;;  %2196 = vst [vmem:[#allocation63_spill] sm:$0xff] %v1775_v2  ;;  %v1785_v42 = vpack.c.bf16 %v188_v24, %v180_v44  ;;  %v1790_v13 = vpack.c.bf16 %v205_v45, %v197_v55  ;;  %v210_v24 = vld [vmem:[#allocation2 + $0x5a0] sm:$0xff]  ;;  %v212_v55 = vld [vmem:[#allocation2 + $0x5b0] sm:$0xff] }
  0x73   :  { %1042 = vmatpush1.bf16.msra.mxu0 %v1757_v20  ;;  %v203_v20 = vld [vmem:[#allocation2 + $0x568] sm:$0xff]  ;;  %v218_v44 = vld [vmem:[#allocation2 + $0x5e0] sm:$0xff] }
  0x74   :  { %1106 = vmatpush1.bf16.msra.mxu1 %v1761_v61  ;;  %1044 = vmatprep.subr.bf16.mxu0 %v1763_v40  ;;  %v1781_v61 = vpack.c.bf16 %v186_v37, %v178_v28  ;;  %2199 = vst [vmem:[#allocation66_spill] sm:$0xff] %v1785_v42  ;;  %v1787_v1 = vpack.c.bf16 %v203_v20, %v195_v46  ;;  %2201 = vst [vmem:[#allocation68_spill] sm:$0xff] %v1790_v13  ;;  %v211_v40 = vld [vmem:[#allocation2 + $0x5a8] sm:$0xff]  ;;  %v213_v28 = vld [vmem:[#allocation2 + $0x5b8] sm:$0xff] }
  0x75   :  { %1108 = vmatprep.subr.bf16.mxu1 %v1766_v22  ;;  %v204_v22 = vld [vmem:[#allocation2 + $0x570] sm:$0xff]  ;;  %v221_v37 = vld [vmem:[#allocation2 + $0x5f8] sm:$0xff] }
  0x76   :  { %2198 = vst [vmem:[#allocation65_spill] sm:$0xff] %v1781_v61  ;;  %2200 = vst [vmem:[#allocation67_spill] sm:$0xff] %v1787_v1  ;;  %v1797_v20 = vpack.c.bf16 %v204_v22, %v196_v11  ;;  %v1802_v45 = vpack.c.bf16 %v221_v37, %v213_v28  ;;  %v226_v22 = vld [vmem:[#allocation2 + $0x620] sm:$0xff]  ;;  %v228_v28 = vld [vmem:[#allocation2 + $0x630] sm:$0xff] }
  0x77   :  { %1046 = vmatpush1.bf16.msra.mxu0 %v1769_v57  ;;  %v219_v57 = vld [vmem:[#allocation2 + $0x5e8] sm:$0xff]  ;;  %v234_v11 = vld [vmem:[#allocation2 + $0x660] sm:$0xff] }
  0x78   :  { %1110 = vmatpush1.bf16.msra.mxu1 %v1773_v60  ;;  %1048 = vmatprep.subr.bf16.mxu0 %v1775_v2  ;;  %v1793_v60 = vpack.c.bf16 %v202_v59, %v194_v47  ;;  %2203 = vst [vmem:[#allocation70_spill] sm:$0xff] %v1797_v20  ;;  %v1799_v46 = vpack.c.bf16 %v219_v57, %v211_v40  ;;  %2205 = vst [vmem:[#allocation72_spill] sm:$0xff] %v1802_v45  ;;  %v227_v2 = vld [vmem:[#allocation2 + $0x628] sm:$0xff]  ;;  %v229_v47 = vld [vmem:[#allocation2 + $0x638] sm:$0xff] }
  0x79   :  { %1112 = vmatprep.subr.bf16.mxu1 %v1778_v54  ;;  %v220_v54 = vld [vmem:[#allocation2 + $0x5f0] sm:$0xff]  ;;  %v237_v59 = vld [vmem:[#allocation2 + $0x678] sm:$0xff] }
  0x7a   :  { %2202 = vst [vmem:[#allocation69_spill] sm:$0xff] %v1793_v60  ;;  %2204 = vst [vmem:[#allocation71_spill] sm:$0xff] %v1799_v46  ;;  %v1809_v57 = vpack.c.bf16 %v220_v54, %v212_v55  ;;  %v1814_v37 = vpack.c.bf16 %v237_v59, %v229_v47  ;;  %v242_v54 = vld [vmem:[#allocation2 + $0x6a0] sm:$0xff]  ;;  %v244_v47 = vld [vmem:[#allocation2 + $0x6b0] sm:$0xff] }
  0x7b   :  { %1050 = vmatpush1.bf16.msra.mxu0 %v1781_v61  ;;  %v235_v61 = vld [vmem:[#allocation2 + $0x668] sm:$0xff]  ;;  %v250_v55 = vld [vmem:[#allocation2 + $0x6e0] sm:$0xff] }
  0x7c   :  { %1114 = vmatpush1.bf16.msra.mxu1 %v1785_v42  ;;  %1052 = vmatprep.subr.bf16.mxu0 %v1787_v1  ;;  %v1805_v42 = vpack.c.bf16 %v218_v44, %v210_v24  ;;  %2207 = vst [vmem:[#allocation74_spill] sm:$0xff] %v1809_v57  ;;  %v1811_v40 = vpack.c.bf16 %v235_v61, %v227_v2  ;;  %2209 = vst [vmem:[#allocation76_spill] sm:$0xff] %v1814_v37  ;;  %v243_v1 = vld [vmem:[#allocation2 + $0x6a8] sm:$0xff]  ;;  %v245_v24 = vld [vmem:[#allocation2 + $0x6b8] sm:$0xff] }
  0x7d   :  { %1116 = vmatprep.subr.bf16.mxu1 %v1790_v13  ;;  %v236_v13 = vld [vmem:[#allocation2 + $0x670] sm:$0xff]  ;;  %v253_v44 = vld [vmem:[#allocation2 + $0x6f8] sm:$0xff] }
  0x7e   :  { %2206 = vst [vmem:[#allocation73_spill] sm:$0xff] %v1805_v42  ;;  %2208 = vst [vmem:[#allocation75_spill] sm:$0xff] %v1811_v40  ;;  %v1821_v61 = vpack.c.bf16 %v236_v13, %v228_v28  ;;  %v1826_v59 = vpack.c.bf16 %v253_v44, %v245_v24  ;;  %v258_v13 = vld [vmem:[#allocation2 + $0x720] sm:$0xff]  ;;  %v260_v24 = vld [vmem:[#allocation2 + $0x730] sm:$0xff] }
  0x7f   :  { %1054 = vmatpush1.bf16.msra.mxu0 %v1793_v60  ;;  %v251_v60 = vld [vmem:[#allocation2 + $0x6e8] sm:$0xff]  ;;  %v266_v28 = vld [vmem:[#allocation2 + $0x760] sm:$0xff] }
  0x80   :  { %1118 = vmatpush1.bf16.msra.mxu1 %v1797_v20  ;;  %1056 = vmatprep.subr.bf16.mxu0 %v1799_v46  ;;  %v1817_v20 = vpack.c.bf16 %v234_v11, %v226_v22  ;;  %2211 = vst [vmem:[#allocation78_spill] sm:$0xff] %v1821_v61  ;;  %v1823_v2 = vpack.c.bf16 %v251_v60, %v243_v1  ;;  %2212 = vst [vmem:[#allocation79_spill] sm:$0xff] %v1826_v59  ;;  %v259_v46 = vld [vmem:[#allocation2 + $0x728] sm:$0xff]  ;;  %v261_v22 = vld [vmem:[#allocation2 + $0x738] sm:$0xff] }
  0x81   :  { %1120 = vmatprep.subr.bf16.mxu1 %v1802_v45  ;;  %v252_v45 = vld [vmem:[#allocation2 + $0x6f0] sm:$0xff]  ;;  %v269_v11 = vld [vmem:[#allocation2 + $0x778] sm:$0xff] }
  0x82   :  { %2210 = vst [vmem:[#allocation77_spill] sm:$0xff] %v1817_v20  ;;  %v1833_v60 = vpack.c.bf16 %v252_v45, %v244_v47  ;;  %v1838_v44 = vpack.c.bf16 %v269_v11, %v261_v22  ;;  %v274_v45 = vld [vmem:[#allocation2 + $0x7a0] sm:$0xff]  ;;  %v276_v11 = vld [vmem:[#allocation2 + $0x7b0] sm:$0xff] }
  0x83   :  { %1058 = vmatpush1.bf16.msra.mxu0 %v1805_v42  ;;  %v267_v42 = vld [vmem:[#allocation2 + $0x768] sm:$0xff]  ;;  %v282_v47 = vld [vmem:[#allocation2 + $0x7e0] sm:$0xff] }
  0x84   :  { %1122 = vmatpush1.bf16.msra.mxu1 %v1809_v57  ;;  %1060 = vmatprep.subr.bf16.mxu0 %v1811_v40  ;;  %v1829_v57 = vpack.c.bf16 %v250_v55, %v242_v54  ;;  %v1835_v1 = vpack.c.bf16 %v267_v42, %v259_v46  ;;  %v275_v40 = vld [vmem:[#allocation2 + $0x7a8] sm:$0xff]  ;;  %v277_v54 = vld [vmem:[#allocation2 + $0x7b8] sm:$0xff] }
  0x85   :  { %1124 = vmatprep.subr.bf16.mxu1 %v1814_v37  ;;  %v268_v37 = vld [vmem:[#allocation2 + $0x770] sm:$0xff]  ;;  %v285_v55 = vld [vmem:[#allocation2 + $0x7f8] sm:$0xff] }
  0x86   :  { %v1845_v42 = vpack.c.bf16 %v268_v37, %v260_v24  ;;  %v1850_v22 = vpack.c.bf16 %v285_v55, %v277_v54  ;;  %v2258_v24 = vld [vmem:[#allocation50_spill] sm:$0xff]  ;;  %v2259_v54 = vld [vmem:[#allocation51_spill] sm:$0xff]  ;;  %v2260_v55 = vld [vmem:[#allocation52_spill] sm:$0xff] }
  0x87   :  { %1062 = vmatpush1.bf16.msra.mxu0 %v1817_v20  ;;  %v283_v20 = vld [vmem:[#allocation2 + $0x7e8] sm:$0xff] }
  0x88   :  { %1126 = vmatpush1.bf16.msra.mxu1 %v1821_v61  ;;  %1064 = vmatprep.subr.bf16.mxu0 %v1823_v2  ;;  %v1841_v61 = vpack.c.bf16 %v266_v28, %v258_v13  ;;  %v1847_v46 = vpack.c.bf16 %v283_v20, %v275_v40  ;;  %v1853_v13 = vpack.c.bf16 %v282_v47, %v274_v45  ;;  %v1868_v20 = vld [vmem:[%s2059_s1 + $0x8] sm:$0xff]  ;;  %v2255_v40 = vld [vmem:[#allocation47_spill] sm:$0xff]  ;;  %v2257_v28 = vld [vmem:[#allocation49_spill] sm:$0xff] }
  0x89   :  { %1128 = vmatprep.subr.bf16.mxu1 %v1826_v59  ;;  %v284_v59 = vld [vmem:[#allocation2 + $0x7f0] sm:$0xff]  ;;  %v2261_v45 = vld [vmem:[#allocation53_spill] sm:$0xff]  ;;  %v2262_v47 = vld [vmem:[#allocation54_spill] sm:$0xff] }
  0x8a   :  { %v1857_v37 = vpack.c.bf16 %v284_v59, %v276_v11  ;;  %v2256_v59 = vld [vmem:[#allocation48_spill] sm:$0xff]  ;;  %v2263_v11 = vld [vmem:[#allocation55_spill] sm:$0xff] }
  0x8b   :  { %1066 = vmatpush1.bf16.msra.mxu0 %v1829_v57 }
  0x8c   :  { %1130 = vmatpush1.bf16.msra.mxu1 %v1833_v60  ;;  %1068 = vmatprep.subr.bf16.mxu0 %v1835_v1 }
  0x8d   :  { %1132 = vmatprep.subr.bf16.mxu1 %v1838_v44 }
  0x8f   :  { %1070 = vmatpush1.bf16.msra.mxu0 %v1841_v61 }
  0x90   :  { %1134 = vmatpush1.bf16.msra.mxu1 %v1845_v42  ;;  %1072 = vmatprep.subr.bf16.mxu0 %v1847_v46 }
  0x91   :  { %1136 = vmatprep.subr.bf16.mxu1 %v1850_v22 }
  0x93   :  { %1074 = vmatpush1.bf16.msra.mxu0 %v1853_v13 }
  0x94   :  { %1138 = vmatpush1.bf16.msra.mxu1 %v1857_v37  ;;  %1140 = vmatprep.subr.bf16.mxu0 %v1462_v3  ;;  %v2213_v3 = vld [vmem:[#allocation5_spill] sm:$0xff] }
  0x95   :  { %1204 = vmatprep.subr.bf16.mxu1 %v1464_v7  ;;  %v2214_v7 = vld [vmem:[#allocation6_spill] sm:$0xff] }
  0x96   :  { %495 = vmatmul.mubr.f32.vlgmr.msra.gmra.mrb[2].mxu0 %v1667_v27 }
  0x97   :  { %566 = vmatmul.mubr.f32.vlgmr.msra.gmra.mrb[2].mxu1 %v1667_v27  ;;  %1142 = vmatpush1.bf16.msra.mxu0 %v1466_v8  ;;  %v2215_v8 = vld [vmem:[#allocation7_spill] sm:$0xff]  ;;  %v2253_v27 = vld [vmem:[#allocation45_spill] sm:$0xff] }
  0x98   :  { %1206 = vmatpush1.bf16.msra.mxu1 %v1469_v12  ;;  %1144 = vmatprep.subr.bf16.mxu0 %v1473_v16  ;;  %v2216_v12 = vld [vmem:[#allocation8_spill] sm:$0xff]  ;;  %v2217_v16 = vld [vmem:[#allocation9_spill] sm:$0xff] }
  0x99   :  { %1208 = vmatprep.subr.bf16.mxu1 %v1475_v17  ;;  %646 = vmatprep.mubr.f32.mxu0 %v1868_v20  ;;  %v2218_v17 = vld [vmem:[#allocation10_spill] sm:$0xff] }
  0x9a   :  { %717 = vmatprep.mubr.f32.mxu1 %v1868_v20 }
  0x9b   :  { %1146 = vmatpush1.bf16.msra.mxu0 %v1478_v21  ;;  %v2219_v21 = vld [vmem:[#allocation11_spill] sm:$0xff] }
  0x9c   :  { %1210 = vmatpush1.bf16.msra.mxu1 %v1482_v25  ;;  %1148 = vmatprep.subr.bf16.mxu0 %v1484_v26  ;;  %v2220_v25 = vld [vmem:[#allocation12_spill] sm:$0xff]  ;;  %v2221_v26 = vld [vmem:[#allocation13_spill] sm:$0xff] }
  0x9d   :  { %1212 = vmatprep.subr.bf16.mxu1 %v1486_v30  ;;  %v2222_v30 = vld [vmem:[#allocation14_spill] sm:$0xff] }
  0x9f   :  { %1150 = vmatpush1.bf16.msra.mxu0 %v1489_v34  ;;  %v2223_v34 = vld [vmem:[#allocation15_spill] sm:$0xff] }
  0xa0   :  { %1214 = vmatpush1.bf16.msra.mxu1 %v1493_v38  ;;  %1152 = vmatprep.subr.bf16.mxu0 %v1495_v39  ;;  %v2224_v38 = vld [vmem:[#allocation16_spill] sm:$0xff]  ;;  %v2225_v39 = vld [vmem:[#allocation17_spill] sm:$0xff] }
  0xa1   :  { %1216 = vmatprep.subr.bf16.mxu1 %v1498_v43  ;;  %v2226_v43 = vld [vmem:[#allocation18_spill] sm:$0xff] }
  0xa3   :  { %1154 = vmatpush1.bf16.msra.mxu0 %v1501_v50  ;;  %v2227_v50 = vld [vmem:[#allocation19_spill] sm:$0xff] }
  0xa4   :  { %1218 = vmatpush1.bf16.msra.mxu1 %v1505_v51  ;;  %1156 = vmatprep.subr.bf16.mxu0 %v1507_v52  ;;  %v2228_v51 = vld [vmem:[#allocation20_spill] sm:$0xff]  ;;  %v2229_v52 = vld [vmem:[#allocation21_spill] sm:$0xff] }
  0xa5   :  { %1220 = vmatprep.subr.bf16.mxu1 %v1510_v56  ;;  %v2230_v56 = vld [vmem:[#allocation22_spill] sm:$0xff] }
  0xa7   :  { %1158 = vmatpush1.bf16.msra.mxu0 %v1513_v62  ;;  %v2231_v62 = vld [vmem:[#allocation23_spill] sm:$0xff] }
  0xa8   :  { %1222 = vmatpush1.bf16.msra.mxu1 %v1517_v63  ;;  %1160 = vmatprep.subr.bf16.mxu0 %v1519_v0  ;;  %v2232_v63 = vld [vmem:[#allocation24_spill] sm:$0xff]  ;;  %v2233_v0 = vld [vmem:[#allocation25_spill] sm:$0xff] }
  0xa9   :  { %1224 = vmatprep.subr.bf16.mxu1 %v1522_v5  ;;  %v2234_v5 = vld [vmem:[#allocation26_spill] sm:$0xff] }
  0xab   :  { %1162 = vmatpush1.bf16.msra.mxu0 %v1525_v14  ;;  %v1937_v14 = vld [vmem:[%s2059_s1] sm:$0xff] }
  0xac   :  { %1226 = vmatpush1.bf16.msra.mxu1 %v1529_v15  ;;  %1164 = vmatprep.subr.bf16.mxu0 %v1531_v18  ;;  %v2235_v15 = vld [vmem:[#allocation27_spill] sm:$0xff]  ;;  %v2236_v18 = vld [vmem:[#allocation28_spill] sm:$0xff] }
  0xad   :  { %1228 = vmatprep.subr.bf16.mxu1 %v1534_v23  ;;  %v2237_v23 = vld [vmem:[#allocation29_spill] sm:$0xff] }
  0xaf   :  { %1166 = vmatpush1.bf16.msra.mxu0 %v1537_v32  ;;  %v2238_v32 = vld [vmem:[#allocation30_spill] sm:$0xff] }
  0xb0   :  { %1230 = vmatpush1.bf16.msra.mxu1 %v1541_v33  ;;  %1168 = vmatprep.subr.bf16.mxu0 %v1543_v35  ;;  %v2239_v33 = vld [vmem:[#allocation31_spill] sm:$0xff]  ;;  %v2240_v35 = vld [vmem:[#allocation32_spill] sm:$0xff] }
  0xb1   :  { %1232 = vmatprep.subr.bf16.mxu1 %v1546_v41  ;;  %v2241_v41 = vld [vmem:[#allocation33_spill] sm:$0xff] }
  0xb3   :  { %1170 = vmatpush1.bf16.msra.mxu0 %v1549_v48  ;;  %v2242_v48 = vld [vmem:[#allocation34_spill] sm:$0xff] }
  0xb4   :  { %1234 = vmatpush1.bf16.msra.mxu1 %v1553_v49  ;;  %1172 = vmatprep.subr.bf16.mxu0 %v1555_v53  ;;  %v2243_v49 = vld [vmem:[#allocation35_spill] sm:$0xff]  ;;  %v2244_v53 = vld [vmem:[#allocation36_spill] sm:$0xff] }
  0xb5   :  { %1236 = vmatprep.subr.bf16.mxu1 %v1558_v58  ;;  %v2245_v58 = vld [vmem:[#allocation37_spill] sm:$0xff] }
  0xb7   :  { %1174 = vmatpush1.bf16.msra.mxu0 %v1561_v4  ;;  %v2246_v4 = vld [vmem:[#allocation38_spill] sm:$0xff] }
  0xb8   :  { %1238 = vmatpush1.bf16.msra.mxu1 %v1565_v6  ;;  %1176 = vmatprep.subr.bf16.mxu0 %v1567_v9  ;;  %v2247_v6 = vld [vmem:[#allocation39_spill] sm:$0xff]  ;;  %v2248_v9 = vld [vmem:[#allocation40_spill] sm:$0xff] }
  0xb9   :  { %1240 = vmatprep.subr.bf16.mxu1 %v1570_v19  ;;  %v2249_v19 = vld [vmem:[#allocation41_spill] sm:$0xff] }
  0xbb   :  { %1178 = vmatpush1.bf16.msra.mxu0 %v1573_v29  ;;  %v2250_v29 = vld [vmem:[#allocation42_spill] sm:$0xff] }
  0xbc   :  { %1242 = vmatpush1.bf16.msra.mxu1 %v1577_v31  ;;  %1180 = vmatprep.subr.bf16.mxu0 %v1579_v36  ;;  %v2251_v31 = vld [vmem:[#allocation43_spill] sm:$0xff]  ;;  %v2252_v36 = vld [vmem:[#allocation44_spill] sm:$0xff] }
  0xbd   :  { %1244 = vmatprep.subr.bf16.mxu1 %v2213_v3  ;;  %v2265_v3 = vld [vmem:[#allocation57_spill] sm:$0xff] }
  0xbf   :  { %1182 = vmatpush1.bf16.msra.mxu0 %v2214_v7  ;;  %v2266_v7 = vld [vmem:[#allocation58_spill] sm:$0xff] }
  0xc0   :  { %1246 = vmatpush1.bf16.msra.mxu1 %v2215_v8  ;;  %1184 = vmatprep.subr.bf16.mxu0 %v2216_v12  ;;  %v2267_v8 = vld [vmem:[#allocation59_spill] sm:$0xff]  ;;  %v2268_v12 = vld [vmem:[#allocation60_spill] sm:$0xff] }
  0xc1   :  { %1248 = vmatprep.subr.bf16.mxu1 %v2217_v16  ;;  %v2269_v16 = vld [vmem:[#allocation61_spill] sm:$0xff] }
  0xc3   :  { %1186 = vmatpush1.bf16.msra.mxu0 %v2218_v17  ;;  %v2270_v17 = vld [vmem:[#allocation62_spill] sm:$0xff] }
  0xc4   :  { %1250 = vmatpush1.bf16.msra.mxu1 %v2219_v21  ;;  %1188 = vmatprep.subr.bf16.mxu0 %v2220_v25  ;;  %v2271_v21 = vld [vmem:[#allocation63_spill] sm:$0xff]  ;;  %v2272_v25 = vld [vmem:[#allocation64_spill] sm:$0xff] }
  0xc5   :  { %1252 = vmatprep.subr.bf16.mxu1 %v2221_v26  ;;  %v2273_v26 = vld [vmem:[#allocation65_spill] sm:$0xff] }
  0xc7   :  { %1190 = vmatpush1.bf16.msra.mxu0 %v2222_v30  ;;  %v2274_v30 = vld [vmem:[#allocation66_spill] sm:$0xff] }
  0xc8   :  { %1254 = vmatpush1.bf16.msra.mxu1 %v2223_v34  ;;  %1192 = vmatprep.subr.bf16.mxu0 %v2224_v38  ;;  %v2275_v34 = vld [vmem:[#allocation67_spill] sm:$0xff]  ;;  %v2276_v38 = vld [vmem:[#allocation68_spill] sm:$0xff] }
  0xc9   :  { %1256 = vmatprep.subr.bf16.mxu1 %v2225_v39  ;;  %v2277_v39 = vld [vmem:[#allocation69_spill] sm:$0xff] }
  0xcb   :  { %1194 = vmatpush1.bf16.msra.mxu0 %v2226_v43  ;;  %v2278_v43 = vld [vmem:[#allocation70_spill] sm:$0xff] }
  0xcc   :  { %1258 = vmatpush1.bf16.msra.mxu1 %v2227_v50  ;;  %1196 = vmatprep.subr.bf16.mxu0 %v2228_v51  ;;  %v2279_v50 = vld [vmem:[#allocation71_spill] sm:$0xff]  ;;  %v2280_v51 = vld [vmem:[#allocation72_spill] sm:$0xff] }
  0xcd   :  { %1260 = vmatprep.subr.bf16.mxu1 %v2229_v52  ;;  %v2281_v52 = vld [vmem:[#allocation73_spill] sm:$0xff] }
  0xcf   :  { %1198 = vmatpush1.bf16.msra.mxu0 %v2230_v56  ;;  %v2282_v56 = vld [vmem:[#allocation74_spill] sm:$0xff] }
  0xd0   :  { %1262 = vmatpush1.bf16.msra.mxu1 %v2231_v62  ;;  %1200 = vmatprep.subr.bf16.mxu0 %v2232_v63  ;;  %v2283_v62 = vld [vmem:[#allocation75_spill] sm:$0xff]  ;;  %v2284_v63 = vld [vmem:[#allocation76_spill] sm:$0xff] }
  0xd1   :  { %1264 = vmatprep.subr.bf16.mxu1 %v2233_v0  ;;  %v2285_v0 = vld [vmem:[#allocation77_spill] sm:$0xff] }
  0xd3   :  { %1202 = vmatpush1.bf16.msra.mxu0 %v2234_v5  ;;  %v2286_v5 = vld [vmem:[#allocation78_spill] sm:$0xff] }
  0xd4   :  { %1266 = vmatpush1.bf16.msra.mxu1 %v2235_v15  ;;  %1268 = vmatprep.subr.bf16.mxu0 %v2236_v18  ;;  %v2287_v15 = vld [vmem:[#allocation79_spill] sm:$0xff] }
  0xd5   :  { %1332 = vmatprep.subr.bf16.mxu1 %v2237_v23 }
  0xd6   :  { %647 = vmatmul.mubr.f32.vlgmr.msra.gmra.mrb[4].mxu0 %v1937_v14 }
  0xd7   :  { %718 = vmatmul.mubr.f32.vlgmr.msra.gmra.mrb[4].mxu1 %v1937_v14  ;;  %1270 = vmatpush1.bf16.msra.mxu0 %v2238_v32 }
  0xd8   :  { %1334 = vmatpush1.bf16.msra.mxu1 %v1673_v10  ;;  %1272 = vmatprep.subr.bf16.mxu0 %v2239_v33  ;;  %v2254_v10 = vld [vmem:[#allocation46_spill] sm:$0xff] }
  0xd9   :  { %1336 = vmatprep.subr.bf16.mxu1 %v2240_v35  ;;  %788 = vmatprep.mubr.f32.mxu0 %v1868_v20 }
  0xda   :  { %859 = vmatprep.mubr.f32.mxu1 %v1868_v20  ;;  %v2264_v20 = vld [vmem:[#allocation56_spill] sm:$0xff] }
  0xdb   :  { %1274 = vmatpush1.bf16.msra.mxu0 %v2241_v41 }
  0xdc   :  { %1338 = vmatpush1.bf16.msra.mxu1 %v2242_v48  ;;  %1276 = vmatprep.subr.bf16.mxu0 %v2243_v49 }
  0xdd   :  { %1340 = vmatprep.subr.bf16.mxu1 %v2244_v53 }
  0xdf   :  { %1278 = vmatpush1.bf16.msra.mxu0 %v2245_v58 }
  0xe0   :  { %1342 = vmatpush1.bf16.msra.mxu1 %v2246_v4  ;;  %1280 = vmatprep.subr.bf16.mxu0 %v2247_v6 }
  0xe1   :  { %1344 = vmatprep.subr.bf16.mxu1 %v2248_v9 }
  0xe3   :  { %1282 = vmatpush1.bf16.msra.mxu0 %v2249_v19 }
  0xe4   :  { %1346 = vmatpush1.bf16.msra.mxu1 %v2250_v29  ;;  %1284 = vmatprep.subr.bf16.mxu0 %v2251_v31 }
  0xe5   :  { %1348 = vmatprep.subr.bf16.mxu1 %v2252_v36 }
  0xe7   :  { %1286 = vmatpush1.bf16.msra.mxu0 %v2253_v27 }
  0xe8   :  { %1350 = vmatpush1.bf16.msra.mxu1 %v2254_v10  ;;  %1288 = vmatprep.subr.bf16.mxu0 %v2255_v40 }
  0xe9   :  { %1352 = vmatprep.subr.bf16.mxu1 %v2256_v59 }
  0xeb   :  { %1290 = vmatpush1.bf16.msra.mxu0 %v2257_v28 }
  0xec   :  { %1354 = vmatpush1.bf16.msra.mxu1 %v2258_v24  ;;  %1292 = vmatprep.subr.bf16.mxu0 %v2259_v54 }
  0xed   :  { %1356 = vmatprep.subr.bf16.mxu1 %v2260_v55 }
  0xef   :  { %1294 = vmatpush1.bf16.msra.mxu0 %v2261_v45 }
  0xf0   :  { %1358 = vmatpush1.bf16.msra.mxu1 %v2262_v47  ;;  %1296 = vmatprep.subr.bf16.mxu0 %v2263_v11 }
  0xf1   :  { %1360 = vmatprep.subr.bf16.mxu1 %v2264_v20 }
  0xf3   :  { %1298 = vmatpush1.bf16.msra.mxu0 %v2265_v3 }
  0xf4   :  { %1362 = vmatpush1.bf16.msra.mxu1 %v2266_v7  ;;  %1300 = vmatprep.subr.bf16.mxu0 %v2267_v8 }
  0xf5   :  { %1364 = vmatprep.subr.bf16.mxu1 %v2268_v12 }
  0xf7   :  { %1302 = vmatpush1.bf16.msra.mxu0 %v2269_v16 }
  0xf8   :  { %1366 = vmatpush1.bf16.msra.mxu1 %v2270_v17  ;;  %1304 = vmatprep.subr.bf16.mxu0 %v2271_v21 }
  0xf9   :  { %1368 = vmatprep.subr.bf16.mxu1 %v2272_v25 }
  0xfb   :  { %1306 = vmatpush1.bf16.msra.mxu0 %v2273_v26 }
  0xfc   :  { %1370 = vmatpush1.bf16.msra.mxu1 %v2274_v30  ;;  %1308 = vmatprep.subr.bf16.mxu0 %v2275_v34 }
  0xfd   :  { %1372 = vmatprep.subr.bf16.mxu1 %v2276_v38 }
  0xff   :  { %1310 = vmatpush1.bf16.msra.mxu0 %v2277_v39 }
 0x100   :  { %1374 = vmatpush1.bf16.msra.mxu1 %v2278_v43  ;;  %1312 = vmatprep.subr.bf16.mxu0 %v2279_v50 }
 0x101   :  { %1376 = vmatprep.subr.bf16.mxu1 %v2280_v51 }
 0x103   :  { %1314 = vmatpush1.bf16.msra.mxu0 %v2281_v52 }
 0x104   :  { %1378 = vmatpush1.bf16.msra.mxu1 %v2282_v56  ;;  %1316 = vmatprep.subr.bf16.mxu0 %v2283_v62 }
 0x105   :  { %1380 = vmatprep.subr.bf16.mxu1 %v2284_v63 }
 0x107   :  { %1318 = vmatpush1.bf16.msra.mxu0 %v2285_v0 }
 0x108   :  { %1382 = vmatpush1.bf16.msra.mxu1 %v2286_v5  ;;  %1320 = vmatprep.subr.bf16.mxu0 %v1823_v2 }
 0x109   :  { %1384 = vmatprep.subr.bf16.mxu1 %v2287_v15 }
 0x10b   :  { %1322 = vmatpush1.bf16.msra.mxu0 %v1829_v57 }
 0x10c   :  { %1386 = vmatpush1.bf16.msra.mxu1 %v1833_v60  ;;  %1324 = vmatprep.subr.bf16.mxu0 %v1835_v1 }
 0x10d   :  { %1388 = vmatprep.subr.bf16.mxu1 %v1838_v44 }
 0x10f   :  { %1326 = vmatpush1.bf16.msra.mxu0 %v1841_v61 }
 0x110   :  { %1390 = vmatpush1.bf16.msra.mxu1 %v1845_v42  ;;  %1328 = vmatprep.subr.bf16.mxu0 %v1847_v46 }
 0x111   :  { %1392 = vmatprep.subr.bf16.mxu1 %v1850_v22 }
 0x113   :  { %1330 = vmatpush1.bf16.msra.mxu0 %v1853_v13 }
 0x114   :  { %1394 = vmatpush1.bf16.msra.mxu1 %v1857_v37 }
 0x116   :  { %789 = vmatmul.mubr.f32.vlgmr.msra.gmra.mrb[6].mxu0 %v1937_v14 }
 0x117   :  { %860 = vmatmul.mubr.f32.vlgmr.msra.gmra.mrb[6].mxu1 %v1937_v14 }
 0x129   :  { %v354_v57 = vpop.f32.mrb[0].mxu0 }
 0x12a   :  { %572 = vst [vmem:[%s2061_s3] sm:$0xff] %v354_v57  ;;  %v425_v61 = vpop.f32.mrb[0].mxu1  ;;  %v356_v2 = vpop.f32.mrb[1].mxu0 }
 0x12b   :  { %574 = vst [vmem:[%s2061_s3 + $0x10] sm:$0xff] %v425_v61  ;;  %573 = vst [vmem:[%s2061_s3 + $0x8] sm:$0xff] %v356_v2  ;;  %v427_v60 = vpop.f32.mrb[1].mxu1 }
 0x12c   :  { %575 = vst [vmem:[%s2061_s3 + $0x18] sm:$0xff] %v427_v60 }
 0x169   :  { %v496_v1 = vpop.f32.mrb[2].mxu0 }
 0x16a   :  { %576 = vst [vmem:[%s2061_s3 + $0x20] sm:$0xff] %v496_v1  ;;  %v567_v44 = vpop.f32.mrb[2].mxu1  ;;  %v498_v42 = vpop.f32.mrb[3].mxu0 }
 0x16b   :  { %578 = vst [vmem:[%s2061_s3 + $0x30] sm:$0xff] %v567_v44  ;;  %577 = vst [vmem:[%s2061_s3 + $0x28] sm:$0xff] %v498_v42  ;;  %v569_v46 = vpop.f32.mrb[3].mxu1 }
 0x16c   :  { %579 = vst [vmem:[%s2061_s3 + $0x38] sm:$0xff] %v569_v46 }
 0x1a9   :  { %v648_v22 = vpop.f32.mrb[4].mxu0 }
 0x1aa   :  { %866 = vst [vmem:[%s2062_s4] sm:$0xff] %v648_v22  ;;  %v719_v13 = vpop.f32.mrb[4].mxu1  ;;  %v650_v37 = vpop.f32.mrb[5].mxu0 }
 0x1ab   :  { %868 = vst [vmem:[%s2062_s4 + $0x10] sm:$0xff] %v719_v13  ;;  %867 = vst [vmem:[%s2062_s4 + $0x8] sm:$0xff] %v650_v37  ;;  %v721_v14 = vpop.f32.mrb[5].mxu1 }
 0x1ac   :  { %869 = vst [vmem:[%s2062_s4 + $0x18] sm:$0xff] %v721_v14 }
 0x1e9   :  { %v790_v18 = vpop.f32.mrb[6].mxu0 }
 0x1ea   :  { %870 = vst [vmem:[%s2062_s4 + $0x20] sm:$0xff] %v790_v18  ;;  %v861_v23 = vpop.f32.mrb[6].mxu1  ;;  %v792_v32 = vpop.f32.mrb[7].mxu0 }
 0x1eb   :  { %872 = vst [vmem:[%s2062_s4 + $0x30] sm:$0xff] %v861_v23  ;;  %871 = vst [vmem:[%s2062_s4 + $0x28] sm:$0xff] %v792_v32  ;;  %v863_v33 = vpop.f32.mrb[7].mxu1 }
 0x1ec   :  { %873 = vst [vmem:[%s2062_s4 + $0x38] sm:$0xff] %v863_v33 }
 0x1ed   :  { %882 = vsyncpa [#allocation3], 1 }

</bundles_post_ra>
